<compile_context>
chip_gen: v7x
topology: tpu7x:2x2x1
jax: 0.10.0
libtpu: 0.0.40
codegen_flags: <defaults>
</compile_context>

<pallas_src>
import jax
import jax.numpy as jnp
from jax.experimental import pallas as pl
from jax.experimental.pallas import tpu as pltpu

# ---- "config" values (synthetic, small) -------------------------------------
HIDDEN = 32          # config.hidden_size
EMB = 32             # config.embedding_dim
NL_VOCAB = 128       # config.nl_vocab_size
VOCAB = 50           # decoder (input) vocab size
B = 4                # batch
T = 8                # encoder time steps
INIT_STD = 0.01      # config.init_normal_std
INIT_UNIF = 0.1      # config.init_uniform_mag


# ------------------------------ Pallas kernel --------------------------------
def decoder_kernel(
    # inputs
    emb_ref, hid_ref, enc_ref, epb_ref, av_ref,
    w_hidcat_ref, w_emb_ih_ref, w_ctxcat_ref, w_out_h_ref,
    gru_b_ref, b_out_ref,
    # outputs
    logp_ref, hid_out_ref, aw_ref,
):
    n_stream, bsz, t, h = enc_ref.shape
    v = b_out_ref.shape[1]

    emb = emb_ref[...]                                        # [B, E]
    hid = hid_ref[...]                                        # [B, H]

    # ---- ONE fused matmul on hid: attention hid-proj (3H) + GRU hidden (3H) --
    hid_proj = jnp.dot(hid, w_hidcat_ref[...],
                       preferred_element_type=jnp.float32)    # [B, 6H]
    hp_all = hid_proj[:, :3 * h]                              # [B, 3H] attn proj
    gh = hid_proj[:, 3 * h:] + gru_b_ref[1:2, :]              # [B, 3H] GRU hidden

    # ---- three attentions, batched over B; enc-side proj precomputed ---------
    stream_scale = (0.5, 0.5, 1.0)                            # src, code, ast
    ctx = jnp.zeros((bsz, h), jnp.float32)
    aw_list = []
    for s in range(n_stream):                                 # 3 static iterations
        enc_s = enc_ref[s]                                    # [B, T, H]
        epb_s = epb_ref[s]                                    # [B, T, H] enc proj + bias
        hp = hp_all[:, s * h:(s + 1) * h]                     # [B, H]
        v_row = av_ref[s:s + 1, :]                            # [1, H]

        energy = jnp.maximum(hp[:, None, :] + epb_s, 0.0)     # [B, T, H]
        scores = jnp.sum(energy * v_row, axis=-1)             # [B, T]  (VPU+XLU)
        m = jnp.max(scores, axis=-1, keepdims=True)           # [B, 1]
        e = jnp.exp(scores - m)
        denom = jnp.sum(e, axis=-1, keepdims=True)
        aw = e / denom                                        # exact softmax
        aw_list.append(aw)
        ctx = ctx + stream_scale[s] * jnp.sum(aw[:, :, None] * enc_s, axis=1)

    aw_ref[...] = jnp.stack(aw_list)                          # single whole-ref store

    # ---- ONE fused matmul on ctx: output half (V) + GRU-input half (3H) ------
    ctx_proj = jnp.dot(ctx, w_ctxcat_ref[...],
                       preferred_element_type=jnp.float32)    # [B, V+3H]
    ctx_out = ctx_proj[:, :v]                                 # [B, V]
    ctx_ih = ctx_proj[:, v:]                                  # [B, 3H]

    # ---- one GRU step (PyTorch gate order: r, z, n), no in-kernel concat -----
    gi = (jnp.dot(emb, w_emb_ih_ref[...], preferred_element_type=jnp.float32)
          + ctx_ih + gru_b_ref[0:1, :])                       # [B, 3H]

    r = jax.nn.sigmoid(gi[:, 0:h] + gh[:, 0:h])
    z = jax.nn.sigmoid(gi[:, h:2 * h] + gh[:, h:2 * h])
    n = jnp.tanh(gi[:, 2 * h:3 * h] + r * gh[:, 2 * h:3 * h])
    h_new = (1.0 - z) * n + z * hid
    hid_out_ref[...] = h_new

    # ---- output projection (split matmul) + log_softmax ----------------------
    logits = (jnp.dot(h_new, w_out_h_ref[...], preferred_element_type=jnp.float32)
              + ctx_out + b_out_ref[...])                     # [B, V]
    m2 = jnp.max(logits, axis=1, keepdims=True)
    lse = m2 + jnp.log(jnp.sum(jnp.exp(logits - m2), axis=1, keepdims=True))
    logp_ref[...] = logits - lse


# ------------------- one-time (per-checkpoint) weight preparation -------------
def prepare_decoder_params(params):
    Hh, E = HIDDEN, EMB
    names = ("src", "code", "ast")

    # attention weights: hidden-side [H,3H] fused with GRU W_hh -> [H, 6H]
    w_ah = jnp.concatenate([params[f"{n}_attn_w"][:, :Hh].T for n in names], axis=1)
    w_hidcat = jnp.concatenate([w_ah, params["w_hh"].T], axis=1)          # [H, 6H]
    # encoder-side attention weights per stream (used once per sequence)
    w_ae_stack = jnp.stack([params[f"{n}_attn_w"][:, Hh:].T for n in names])  # [3,H,H]
    ab = jnp.stack([params[f"{n}_attn_b"] for n in names])                # [3, H]
    av = jnp.stack([params[f"{n}_v"] for n in names])                     # [3, H]

    # GRU input weights split: embedding half and context half
    w_ih_t = params["w_ih"].T                                             # [E+H, 3H]
    w_emb_ih = w_ih_t[:E]                                                 # [E, 3H]
    w_ctx_ih = w_ih_t[E:]                                                 # [H, 3H]
    # output weights split: hidden half and context half
    w_out_t = params["w_out"].T                                           # [2H, V]
    w_out_h = w_out_t[:Hh]                                                # [H, V]
    w_ctx_out = w_out_t[Hh:]                                              # [H, V]
    # fuse the two ctx-side matmuls: [H, V+3H] (V first so slices are aligned)
    w_ctxcat = jnp.concatenate([w_ctx_out, w_ctx_ih], axis=1)             # [H, V+3H]

    return dict(
        embedding=params["embedding"],
        w_hidcat=w_hidcat, w_ae_stack=w_ae_stack, ab=ab, av=av,
        w_emb_ih=w_emb_ih, w_ctxcat=w_ctxcat, w_out_h=w_out_h,
        gru_b=jnp.stack([params["b_ih"], params["b_hh"]]),                # [2, 3H]
        b_out=params["b_out"][None, :],                                   # [1, V]
    )


# ------------------- once-per-sequence encoder preparation --------------------
def prepare_encoder_states(prepped, source_outputs, code_outputs, ast_outputs):
    hp = jax.lax.Precision.HIGHEST
    enc_all = jnp.stack([source_outputs, code_outputs, ast_outputs])      # [3,T,B,H]
    enc_all = jnp.transpose(enc_all, (0, 2, 1, 3))                        # [3,B,T,H]
    # hid-independent part of the attention energy: enc @ W_ae + b
    epb = (jnp.einsum("sbth,shk->sbtk", enc_all, prepped["w_ae_stack"], precision=hp)
           + prepped["ab"][:, None, None, :])                             # [3,B,T,H]
    return enc_all, epb


# ------------------------------ per-step wrapper ------------------------------
def decoder_step(prepped, inputs, last_hidden, enc_all, epb):
    Hh = HIDDEN
    bsz = inputs.shape[0]
    t = enc_all.shape[2]
    v_nl = prepped["b_out"].shape[1]

    emb = prepped["embedding"][inputs]                        # [B, E] gather = glue
    hid = last_hidden[0]                                      # [B, H]

    args = [
        emb, hid, enc_all, epb, prepped["av"],
        prepped["w_hidcat"], prepped["w_emb_ih"], prepped["w_ctxcat"],
        prepped["w_out_h"], prepped["gru_b"], prepped["b_out"],
    ]
    out_shape = (
        jax.ShapeDtypeStruct((bsz, v_nl), jnp.float32),       # log-probs
        jax.ShapeDtypeStruct((bsz, Hh), jnp.float32),         # new hidden
        jax.ShapeDtypeStruct((3, bsz, t), jnp.float32),       # attn weights
    )
    vmem = pltpu.MemorySpace.VMEM
    logp, h_new, aw_all = pl.pallas_call(
        decoder_kernel,
        out_shape=out_shape,
        in_specs=[pl.BlockSpec(memory_space=vmem)] * len(args),
        out_specs=tuple(pl.BlockSpec(memory_space=vmem) for _ in range(3)),
    )(*args)

    hidden = h_new[None]                                      # [1, B, H]
    src_aw = aw_all[0][:, None, :]                            # [B, 1, T]
    code_aw = aw_all[1][:, None, :]
    ast_aw = aw_all[2][:, None, :]
    return logp, hidden, src_aw, code_aw, ast_aw


# --------------------------- pure-JAX reference --------------------------------
def decoder_reference(params, inputs, last_hidden, source_outputs, code_outputs,
                      ast_outputs):
    Hh = HIDDEN
    hp = jax.lax.Precision.HIGHEST
    emb = params["embedding"][inputs]                         # [B, E]

    def attn(hidden, enc, w, b, v):
        t = enc.shape[0]
        hrep = jnp.transpose(jnp.tile(hidden, (t, 1, 1)), (1, 0, 2))   # [B,T,H]
        eo = jnp.transpose(enc, (1, 0, 2))                             # [B,T,H]
        x = jnp.concatenate([hrep, eo], axis=2)                        # [B,T,2H]
        energy = jax.nn.relu(jnp.einsum("bti,oi->bto", x, w, precision=hp) + b)
        scores = jnp.einsum("bth,h->bt", energy, v, precision=hp)
        return jax.nn.softmax(scores, axis=1)[:, None, :]              # [B,1,T]

    def context_of(aw, enc):
        eo = jnp.transpose(enc, (1, 0, 2))
        return jnp.einsum("bqt,bth->bqh", aw, eo, precision=hp)        # [B,1,H]

    src_aw = attn(last_hidden, source_outputs,
                  params["src_attn_w"], params["src_attn_b"], params["src_v"])
    code_aw = attn(last_hidden, code_outputs,
                   params["code_attn_w"], params["code_attn_b"], params["code_v"])
    ast_aw = attn(last_hidden, ast_outputs,
                  params["ast_attn_w"], params["ast_attn_b"], params["ast_v"])

    ctx = (0.5 * context_of(src_aw, source_outputs)
           + 0.5 * context_of(code_aw, code_outputs)
           + context_of(ast_aw, ast_outputs))[:, 0, :]                 # [B, H]

    x = jnp.concatenate([emb, ctx], axis=1)
    gi = jnp.dot(x, params["w_ih"].T, precision=hp) + params["b_ih"]
    gh = jnp.dot(last_hidden[0], params["w_hh"].T, precision=hp) + params["b_hh"]
    r = jax.nn.sigmoid(gi[:, :Hh] + gh[:, :Hh])
    z = jax.nn.sigmoid(gi[:, Hh:2 * Hh] + gh[:, Hh:2 * Hh])
    n = jnp.tanh(gi[:, 2 * Hh:] + r * gh[:, 2 * Hh:])
    h_new = (1.0 - z) * n + z * last_hidden[0]

    o_in = jnp.concatenate([h_new, ctx], axis=1)
    logits = jnp.dot(o_in, params["w_out"].T, precision=hp) + params["b_out"]
    logp = jax.nn.log_softmax(logits, axis=1)
    return logp, h_new[None], src_aw, code_aw, ast_aw


# ------------------------------ params init ------------------------------------
def init_params(key):
    Hh, E = HIDDEN, EMB
    ks = iter(jax.random.split(key, 20))
    params = {}
    params["embedding"] = jax.random.normal(next(ks), (VOCAB, E), jnp.float32) * INIT_STD
    for name in ("src", "code", "ast"):
        params[f"{name}_attn_w"] = jax.random.uniform(
            next(ks), (Hh, 2 * Hh), jnp.float32, -INIT_UNIF, INIT_UNIF)
        params[f"{name}_attn_b"] = jax.random.uniform(
            next(ks), (Hh,), jnp.float32, -INIT_UNIF, INIT_UNIF)
        params[f"{name}_v"] = jax.random.normal(next(ks), (Hh,), jnp.float32) / jnp.sqrt(float(Hh))
    params["w_ih"] = jax.random.uniform(next(ks), (3 * Hh, E + Hh), jnp.float32,
                                        -INIT_UNIF, INIT_UNIF)
    params["w_hh"] = jax.random.uniform(next(ks), (3 * Hh, Hh), jnp.float32,
                                        -INIT_UNIF, INIT_UNIF)
    gru_bias = jnp.zeros((3 * Hh,), jnp.float32).at[(3 * Hh) // 4:(3 * Hh) // 2].set(1.0)
    params["b_ih"] = gru_bias            # mirrors init_rnn_wt's fill pattern
    params["b_hh"] = gru_bias
    params["w_out"] = jax.random.normal(next(ks), (NL_VOCAB, 2 * Hh), jnp.float32) * INIT_STD
    params["b_out"] = jax.random.normal(next(ks), (NL_VOCAB,), jnp.float32) * INIT_STD
    return params


# ---------------------------------- main ---------------------------------------
if __name__ == "__main__":
    key = jax.random.PRNGKey(0)
    k_p, k_in, k_h, k_s, k_c, k_a = jax.random.split(key, 6)
    params = init_params(k_p)

    inputs = jax.random.randint(k_in, (B,), 0, VOCAB)                       # [B]
    last_hidden = jax.random.normal(k_h, (1, B, HIDDEN), jnp.float32)       # [1,B,H]
    source_outputs = jax.random.normal(k_s, (T, B, HIDDEN), jnp.float32)    # [T,B,H]
    code_outputs = jax.random.normal(k_c, (T, B, HIDDEN), jnp.float32)      # [T,B,H]
    ast_outputs = jax.random.normal(k_a, (T, B, HIDDEN), jnp.float32)       # [T,B,H]

    # amortizable prep: once per checkpoint / once per sequence
    prepped = prepare_decoder_params(params)
    enc_all, epb = prepare_encoder_states(prepped, source_outputs,
                                          code_outputs, ast_outputs)

    # per-decode-step call
    outs = decoder_step(prepped, inputs, last_hidden, enc_all, epb)
    outs = jax.block_until_ready(outs)

    refs = decoder_reference(params, inputs, last_hidden,
                             source_outputs, code_outputs, ast_outputs)
    names = ["log_probs", "hidden", "src_attn", "code_attn", "ast_attn"]
    for name, got, want in zip(names, outs, refs):
        assert got.shape == want.shape, (name, got.shape, want.shape)
        err = float(jnp.max(jnp.abs(got - want)))
        assert err < 2e-3, f"{name} mismatch, max abs err = {err}"

    print("KERNEL_OK")
</pallas_src>

<mosaic_0001>
module attributes {stable_mosaic.version = 11 : i64} {
  func.func @decoder_kernel(%arg0: memref<4x32xf32, #tpu.memory_space<vmem>>, %arg1: memref<4x32xf32, #tpu.memory_space<vmem>>, %arg2: memref<3x4x8x32xf32, #tpu.memory_space<vmem>>, %arg3: memref<3x4x8x32xf32, #tpu.memory_space<vmem>>, %arg4: memref<3x32xf32, #tpu.memory_space<vmem>>, %arg5: memref<32x192xf32, #tpu.memory_space<vmem>>, %arg6: memref<32x96xf32, #tpu.memory_space<vmem>>, %arg7: memref<32x224xf32, #tpu.memory_space<vmem>>, %arg8: memref<32x128xf32, #tpu.memory_space<vmem>>, %arg9: memref<2x96xf32, #tpu.memory_space<vmem>>, %arg10: memref<1x128xf32, #tpu.memory_space<vmem>>, %arg11: memref<4x128xf32, #tpu.memory_space<vmem>>, %arg12: memref<4x32xf32, #tpu.memory_space<vmem>>, %arg13: memref<3x4x8xf32, #tpu.memory_space<vmem>>) attributes {dimension_semantics = [], scalar_prefetch = 0 : i64, scratch_operands = 0 : i64, tpu.core_type = #tpu.core_type<tc>} {
    %c0 = arith.constant 0 : index
    %c0_0 = arith.constant 0 : index
    %0 = vector.load %arg0[%c0, %c0_0] : memref<4x32xf32, #tpu.memory_space<vmem>>, vector<4x32xf32>
    %c0_1 = arith.constant 0 : index
    %c0_2 = arith.constant 0 : index
    %1 = vector.load %arg1[%c0_1, %c0_2] : memref<4x32xf32, #tpu.memory_space<vmem>>, vector<4x32xf32>
    %c0_3 = arith.constant 0 : index
    %c0_4 = arith.constant 0 : index
    %2 = vector.load %arg5[%c0_3, %c0_4] : memref<32x192xf32, #tpu.memory_space<vmem>>, vector<32x192xf32>
    %cst = arith.constant dense<0.000000e+00> : vector<4x192xf32>
    %3 = tpu.matmul %1, %2, %cst {dimension_numbers = #tpu.dot_dimension_numbers<[1], [0], [0], [1], [0, 0, 1, 1], [], []>} : vector<4x32xf32>, vector<32x192xf32>, vector<4x192xf32> -> vector<4x192xf32>
    %4 = vector.extract_strided_slice %3 {offsets = [0, 0], sizes = [4, 96], strides = [1, 1]} : vector<4x192xf32> to vector<4x96xf32>
    %5 = vector.extract_strided_slice %3 {offsets = [0, 96], sizes = [4, 96], strides = [1, 1]} : vector<4x192xf32> to vector<4x96xf32>
    %c1 = arith.constant 1 : index
    %c0_5 = arith.constant 0 : index
    %6 = vector.load %arg9[%c1, %c0_5] : memref<2x96xf32, #tpu.memory_space<vmem>>, vector<1x96xf32>
    %7 = vector.broadcast %6 : vector<1x96xf32> to vector<4x96xf32>
    %8 = arith.addf %5, %7 : vector<4x96xf32>
    %cst_6 = arith.constant 0.000000e+00 : f32
    %9 = vector.broadcast %cst_6 : f32 to vector<4x32xf32>
    %c0_7 = arith.constant 0 : index
    %c0_8 = arith.constant 0 : index
    %c0_9 = arith.constant 0 : index
    %c0_10 = arith.constant 0 : index
    %10 = vector.load %arg2[%c0_7, %c0_8, %c0_9, %c0_10] : memref<3x4x8x32xf32, #tpu.memory_space<vmem>>, vector<1x4x8x32xf32>
    %11 = vector.shape_cast %10 : vector<1x4x8x32xf32> to vector<4x8x32xf32>
    %c0_11 = arith.constant 0 : index
    %c0_12 = arith.constant 0 : index
    %c0_13 = arith.constant 0 : index
    %c0_14 = arith.constant 0 : index
    %12 = vector.load %arg3[%c0_11, %c0_12, %c0_13, %c0_14] : memref<3x4x8x32xf32, #tpu.memory_space<vmem>>, vector<1x4x8x32xf32>
    %13 = vector.shape_cast %12 : vector<1x4x8x32xf32> to vector<4x8x32xf32>
    %14 = vector.extract_strided_slice %4 {offsets = [0, 0], sizes = [4, 32], strides = [1, 1]} : vector<4x96xf32> to vector<4x32xf32>
    %c0_15 = arith.constant 0 : index
    %c0_16 = arith.constant 0 : index
    %15 = vector.load %arg4[%c0_15, %c0_16] : memref<3x32xf32, #tpu.memory_space<vmem>>, vector<1x32xf32>
    %16 = vector.shape_cast %14 : vector<4x32xf32> to vector<4x1x32xf32>
    %17 = vector.broadcast %16 : vector<4x1x32xf32> to vector<4x8x32xf32>
    %18 = arith.addf %17, %13 : vector<4x8x32xf32>
    %cst_17 = arith.constant 0.000000e+00 : f32
    %19 = vector.broadcast %cst_17 : f32 to vector<4x8x32xf32>
    %20 = arith.maximumf %18, %19 : vector<4x8x32xf32>
    %21 = vector.shape_cast %15 : vector<1x32xf32> to vector<1x1x32xf32>
    %22 = vector.broadcast %21 : vector<1x1x32xf32> to vector<4x8x32xf32>
    %23 = arith.mulf %20, %22 : vector<4x8x32xf32>
    %cst_18 = arith.constant dense<0.000000e+00> : vector<4x8xf32>
    %24 = vector.multi_reduction <add>, %23, %cst_18 [2] : vector<4x8x32xf32> to vector<4x8xf32>
    %cst_19 = arith.constant dense<0xFF800000> : vector<4xf32>
    %25 = vector.multi_reduction <maximumf>, %24, %cst_19 [1] : vector<4x8xf32> to vector<4xf32>
    %26 = vector.shape_cast %25 : vector<4xf32> to vector<4x1xf32>
    %27 = vector.broadcast %26 : vector<4x1xf32> to vector<4x8xf32>
    %28 = arith.subf %24, %27 : vector<4x8xf32>
    %29 = math.exp %28 : vector<4x8xf32>
    %cst_20 = arith.constant dense<0.000000e+00> : vector<4xf32>
    %30 = vector.multi_reduction <add>, %29, %cst_20 [1] : vector<4x8xf32> to vector<4xf32>
    %31 = vector.shape_cast %30 : vector<4xf32> to vector<4x1xf32>
    %32 = vector.broadcast %31 : vector<4x1xf32> to vector<4x8xf32>
    %33 = arith.divf %29, %32 : vector<4x8xf32>
    %34 = vector.shape_cast %33 : vector<4x8xf32> to vector<4x8x1xf32>
    %35 = vector.broadcast %34 : vector<4x8x1xf32> to vector<4x8x32xf32>
    %36 = arith.mulf %35, %11 : vector<4x8x32xf32>
    %cst_21 = arith.constant dense<0.000000e+00> : vector<4x32xf32>
    %37 = vector.multi_reduction <add>, %36, %cst_21 [1] : vector<4x8x32xf32> to vector<4x32xf32>
    %cst_22 = arith.constant 5.000000e-01 : f32
    %38 = vector.broadcast %cst_22 : f32 to vector<4x32xf32>
    %39 = arith.mulf %38, %37 : vector<4x32xf32>
    %40 = arith.addf %9, %39 : vector<4x32xf32>
    %c1_23 = arith.constant 1 : index
    %c0_24 = arith.constant 0 : index
    %c0_25 = arith.constant 0 : index
    %c0_26 = arith.constant 0 : index
    %41 = vector.load %arg2[%c1_23, %c0_24, %c0_25, %c0_26] : memref<3x4x8x32xf32, #tpu.memory_space<vmem>>, vector<1x4x8x32xf32>
    %42 = vector.shape_cast %41 : vector<1x4x8x32xf32> to vector<4x8x32xf32>
    %c1_27 = arith.constant 1 : index
    %c0_28 = arith.constant 0 : index
    %c0_29 = arith.constant 0 : index
    %c0_30 = arith.constant 0 : index
    %43 = vector.load %arg3[%c1_27, %c0_28, %c0_29, %c0_30] : memref<3x4x8x32xf32, #tpu.memory_space<vmem>>, vector<1x4x8x32xf32>
    %44 = vector.shape_cast %43 : vector<1x4x8x32xf32> to vector<4x8x32xf32>
    %45 = vector.extract_strided_slice %4 {offsets = [0, 32], sizes = [4, 32], strides = [1, 1]} : vector<4x96xf32> to vector<4x32xf32>
    %c1_31 = arith.constant 1 : index
    %c0_32 = arith.constant 0 : index
    %46 = vector.load %arg4[%c1_31, %c0_32] : memref<3x32xf32, #tpu.memory_space<vmem>>, vector<1x32xf32>
    %47 = vector.shape_cast %45 : vector<4x32xf32> to vector<4x1x32xf32>
    %48 = vector.broadcast %47 : vector<4x1x32xf32> to vector<4x8x32xf32>
    %49 = arith.addf %48, %44 : vector<4x8x32xf32>
    %cst_33 = arith.constant 0.000000e+00 : f32
    %50 = vector.broadcast %cst_33 : f32 to vector<4x8x32xf32>
    %51 = arith.maximumf %49, %50 : vector<4x8x32xf32>
    %52 = vector.shape_cast %46 : vector<1x32xf32> to vector<1x1x32xf32>
    %53 = vector.broadcast %52 : vector<1x1x32xf32> to vector<4x8x32xf32>
    %54 = arith.mulf %51, %53 : vector<4x8x32xf32>
    %cst_34 = arith.constant dense<0.000000e+00> : vector<4x8xf32>
    %55 = vector.multi_reduction <add>, %54, %cst_34 [2] : vector<4x8x32xf32> to vector<4x8xf32>
    %cst_35 = arith.constant dense<0xFF800000> : vector<4xf32>
    %56 = vector.multi_reduction <maximumf>, %55, %cst_35 [1] : vector<4x8xf32> to vector<4xf32>
    %57 = vector.shape_cast %56 : vector<4xf32> to vector<4x1xf32>
    %58 = vector.broadcast %57 : vector<4x1xf32> to vector<4x8xf32>
    %59 = arith.subf %55, %58 : vector<4x8xf32>
    %60 = math.exp %59 : vector<4x8xf32>
    %cst_36 = arith.constant dense<0.000000e+00> : vector<4xf32>
    %61 = vector.multi_reduction <add>, %60, %cst_36 [1] : vector<4x8xf32> to vector<4xf32>
    %62 = vector.shape_cast %61 : vector<4xf32> to vector<4x1xf32>
    %63 = vector.broadcast %62 : vector<4x1xf32> to vector<4x8xf32>
    %64 = arith.divf %60, %63 : vector<4x8xf32>
    %65 = vector.shape_cast %64 : vector<4x8xf32> to vector<4x8x1xf32>
    %66 = vector.broadcast %65 : vector<4x8x1xf32> to vector<4x8x32xf32>
    %67 = arith.mulf %66, %42 : vector<4x8x32xf32>
    %cst_37 = arith.constant dense<0.000000e+00> : vector<4x32xf32>
    %68 = vector.multi_reduction <add>, %67, %cst_37 [1] : vector<4x8x32xf32> to vector<4x32xf32>
    %cst_38 = arith.constant 5.000000e-01 : f32
    %69 = vector.broadcast %cst_38 : f32 to vector<4x32xf32>
    %70 = arith.mulf %69, %68 : vector<4x32xf32>
    %71 = arith.addf %40, %70 : vector<4x32xf32>
    %c2 = arith.constant 2 : index
    %c0_39 = arith.constant 0 : index
    %c0_40 = arith.constant 0 : index
    %c0_41 = arith.constant 0 : index
    %72 = vector.load %arg2[%c2, %c0_39, %c0_40, %c0_41] : memref<3x4x8x32xf32, #tpu.memory_space<vmem>>, vector<1x4x8x32xf32>
    %73 = vector.shape_cast %72 : vector<1x4x8x32xf32> to vector<4x8x32xf32>
    %c2_42 = arith.constant 2 : index
    %c0_43 = arith.constant 0 : index
    %c0_44 = arith.constant 0 : index
    %c0_45 = arith.constant 0 : index
    %74 = vector.load %arg3[%c2_42, %c0_43, %c0_44, %c0_45] : memref<3x4x8x32xf32, #tpu.memory_space<vmem>>, vector<1x4x8x32xf32>
    %75 = vector.shape_cast %74 : vector<1x4x8x32xf32> to vector<4x8x32xf32>
    %76 = vector.extract_strided_slice %4 {offsets = [0, 64], sizes = [4, 32], strides = [1, 1]} : vector<4x96xf32> to vector<4x32xf32>
    %c2_46 = arith.constant 2 : index
    %c0_47 = arith.constant 0 : index
    %77 = vector.load %arg4[%c2_46, %c0_47] : memref<3x32xf32, #tpu.memory_space<vmem>>, vector<1x32xf32>
    %78 = vector.shape_cast %76 : vector<4x32xf32> to vector<4x1x32xf32>
    %79 = vector.broadcast %78 : vector<4x1x32xf32> to vector<4x8x32xf32>
    %80 = arith.addf %79, %75 : vector<4x8x32xf32>
    %cst_48 = arith.constant 0.000000e+00 : f32
    %81 = vector.broadcast %cst_48 : f32 to vector<4x8x32xf32>
    %82 = arith.maximumf %80, %81 : vector<4x8x32xf32>
    %83 = vector.shape_cast %77 : vector<1x32xf32> to vector<1x1x32xf32>
    %84 = vector.broadcast %83 : vector<1x1x32xf32> to vector<4x8x32xf32>
    %85 = arith.mulf %82, %84 : vector<4x8x32xf32>
    %cst_49 = arith.constant dense<0.000000e+00> : vector<4x8xf32>
    %86 = vector.multi_reduction <add>, %85, %cst_49 [2] : vector<4x8x32xf32> to vector<4x8xf32>
    %cst_50 = arith.constant dense<0xFF800000> : vector<4xf32>
    %87 = vector.multi_reduction <maximumf>, %86, %cst_50 [1] : vector<4x8xf32> to vector<4xf32>
    %88 = vector.shape_cast %87 : vector<4xf32> to vector<4x1xf32>
    %89 = vector.broadcast %88 : vector<4x1xf32> to vector<4x8xf32>
    %90 = arith.subf %86, %89 : vector<4x8xf32>
    %91 = math.exp %90 : vector<4x8xf32>
    %cst_51 = arith.constant dense<0.000000e+00> : vector<4xf32>
    %92 = vector.multi_reduction <add>, %91, %cst_51 [1] : vector<4x8xf32> to vector<4xf32>
    %93 = vector.shape_cast %92 : vector<4xf32> to vector<4x1xf32>
    %94 = vector.broadcast %93 : vector<4x1xf32> to vector<4x8xf32>
    %95 = arith.divf %91, %94 : vector<4x8xf32>
    %96 = vector.shape_cast %95 : vector<4x8xf32> to vector<4x8x1xf32>
    %97 = vector.broadcast %96 : vector<4x8x1xf32> to vector<4x8x32xf32>
    %98 = arith.mulf %97, %73 : vector<4x8x32xf32>
    %cst_52 = arith.constant dense<0.000000e+00> : vector<4x32xf32>
    %99 = vector.multi_reduction <add>, %98, %cst_52 [1] : vector<4x8x32xf32> to vector<4x32xf32>
    %cst_53 = arith.constant 1.000000e+00 : f32
    %100 = vector.broadcast %cst_53 : f32 to vector<4x32xf32>
    %101 = arith.mulf %100, %99 : vector<4x32xf32>
    %102 = arith.addf %71, %101 : vector<4x32xf32>
    %103 = vector.shape_cast %33 : vector<4x8xf32> to vector<1x4x8xf32>
    %104 = vector.shape_cast %64 : vector<4x8xf32> to vector<1x4x8xf32>
    %105 = vector.shape_cast %95 : vector<4x8xf32> to vector<1x4x8xf32>
    %106 = tpu.concatenate %103, %104, %105 in 0 : vector<1x4x8xf32>, vector<1x4x8xf32>, vector<1x4x8xf32> -> vector<3x4x8xf32>
    %c0_54 = arith.constant 0 : index
    %c0_55 = arith.constant 0 : index
    %c0_56 = arith.constant 0 : index
    %107 = vector.load %arg13[%c0_54, %c0_55, %c0_56] : memref<3x4x8xf32, #tpu.memory_space<vmem>>, vector<3x4x8xf32>
    tpu.vector_store %arg13[%c0_54, %c0_55, %c0_56], %106 {strides = array<i32>} : memref<3x4x8xf32, #tpu.memory_space<vmem>>, vector<3x4x8xf32>,
    %c0_57 = arith.constant 0 : index
    %c0_58 = arith.constant 0 : index
    %108 = vector.load %arg7[%c0_57, %c0_58] : memref<32x224xf32, #tpu.memory_space<vmem>>, vector<32x224xf32>
    %cst_59 = arith.constant dense<0.000000e+00> : vector<4x224xf32>
    %109 = tpu.matmul %102, %108, %cst_59 {dimension_numbers = #tpu.dot_dimension_numbers<[1], [0], [0], [1], [0, 0, 1, 1], [], []>} : vector<4x32xf32>, vector<32x224xf32>, vector<4x224xf32> -> vector<4x224xf32>
    %110 = vector.extract_strided_slice %109 {offsets = [0, 0], sizes = [4, 128], strides = [1, 1]} : vector<4x224xf32> to vector<4x128xf32>
    %111 = vector.extract_strided_slice %109 {offsets = [0, 128], sizes = [4, 96], strides = [1, 1]} : vector<4x224xf32> to vector<4x96xf32>
    %c0_60 = arith.constant 0 : index
    %c0_61 = arith.constant 0 : index
    %112 = vector.load %arg6[%c0_60, %c0_61] : memref<32x96xf32, #tpu.memory_space<vmem>>, vector<32x96xf32>
    %cst_62 = arith.constant dense<0.000000e+00> : vector<4x96xf32>
    %113 = tpu.matmul %0, %112, %cst_62 {dimension_numbers = #tpu.dot_dimension_numbers<[1], [0], [0], [1], [0, 0, 1, 1], [], []>} : vector<4x32xf32>, vector<32x96xf32>, vector<4x96xf32> -> vector<4x96xf32>
    %114 = arith.addf %113, %111 : vector<4x96xf32>
    %c0_63 = arith.constant 0 : index
    %c0_64 = arith.constant 0 : index
    %115 = vector.load %arg9[%c0_63, %c0_64] : memref<2x96xf32, #tpu.memory_space<vmem>>, vector<1x96xf32>
    %116 = vector.broadcast %115 : vector<1x96xf32> to vector<4x96xf32>
    %117 = arith.addf %114, %116 : vector<4x96xf32>
    %118 = vector.extract_strided_slice %117 {offsets = [0, 0], sizes = [4, 32], strides = [1, 1]} : vector<4x96xf32> to vector<4x32xf32>
    %119 = vector.extract_strided_slice %8 {offsets = [0, 0], sizes = [4, 32], strides = [1, 1]} : vector<4x96xf32> to vector<4x32xf32>
    %120 = arith.addf %118, %119 : vector<4x32xf32>
    %121 = arith.negf %120 : vector<4x32xf32>
    %122 = math.exp %121 : vector<4x32xf32>
    %cst_65 = arith.constant 1.000000e+00 : f32
    %123 = vector.broadcast %cst_65 : f32 to vector<4x32xf32>
    %124 = arith.addf %123, %122 : vector<4x32xf32>
    %125 = arith.divf %123, %124 : vector<4x32xf32>
    %126 = vector.extract_strided_slice %117 {offsets = [0, 32], sizes = [4, 32], strides = [1, 1]} : vector<4x96xf32> to vector<4x32xf32>
    %127 = vector.extract_strided_slice %8 {offsets = [0, 32], sizes = [4, 32], strides = [1, 1]} : vector<4x96xf32> to vector<4x32xf32>
    %128 = arith.addf %126, %127 : vector<4x32xf32>
    %129 = arith.negf %128 : vector<4x32xf32>
    %130 = math.exp %129 : vector<4x32xf32>
    %cst_66 = arith.constant 1.000000e+00 : f32
    %131 = vector.broadcast %cst_66 : f32 to vector<4x32xf32>
    %132 = arith.addf %131, %130 : vector<4x32xf32>
    %133 = arith.divf %131, %132 : vector<4x32xf32>
    %134 = vector.extract_strided_slice %117 {offsets = [0, 64], sizes = [4, 32], strides = [1, 1]} : vector<4x96xf32> to vector<4x32xf32>
    %135 = vector.extract_strided_slice %8 {offsets = [0, 64], sizes = [4, 32], strides = [1, 1]} : vector<4x96xf32> to vector<4x32xf32>
    %136 = arith.mulf %125, %135 : vector<4x32xf32>
    %137 = arith.addf %134, %136 : vector<4x32xf32>
    %138 = math.tanh %137 : vector<4x32xf32>
    %cst_67 = arith.constant 1.000000e+00 : f32
    %139 = vector.broadcast %cst_67 : f32 to vector<4x32xf32>
    %140 = arith.subf %139, %133 : vector<4x32xf32>
    %141 = arith.mulf %140, %138 : vector<4x32xf32>
    %142 = arith.mulf %133, %1 : vector<4x32xf32>
    %143 = arith.addf %141, %142 : vector<4x32xf32>
    %c0_68 = arith.constant 0 : index
    %c0_69 = arith.constant 0 : index
    %144 = vector.load %arg12[%c0_68, %c0_69] : memref<4x32xf32, #tpu.memory_space<vmem>>, vector<4x32xf32>
    tpu.vector_store %arg12[%c0_68, %c0_69], %143 {strides = array<i32>} : memref<4x32xf32, #tpu.memory_space<vmem>>, vector<4x32xf32>,
    %c0_70 = arith.constant 0 : index
    %c0_71 = arith.constant 0 : index
    %145 = vector.load %arg8[%c0_70, %c0_71] : memref<32x128xf32, #tpu.memory_space<vmem>>, vector<32x128xf32>
    %cst_72 = arith.constant dense<0.000000e+00> : vector<4x128xf32>
    %146 = tpu.matmul %143, %145, %cst_72 {dimension_numbers = #tpu.dot_dimension_numbers<[1], [0], [0], [1], [0, 0, 1, 1], [], []>} : vector<4x32xf32>, vector<32x128xf32>, vector<4x128xf32> -> vector<4x128xf32>
    %147 = arith.addf %146, %110 : vector<4x128xf32>
    %c0_73 = arith.constant 0 : index
    %c0_74 = arith.constant 0 : index
    %148 = vector.load %arg10[%c0_73, %c0_74] : memref<1x128xf32, #tpu.memory_space<vmem>>, vector<1x128xf32>
    %149 = vector.broadcast %148 : vector<1x128xf32> to vector<4x128xf32>
    %150 = arith.addf %147, %149 : vector<4x128xf32>
    %cst_75 = arith.constant dense<0xFF800000> : vector<4xf32>
    %151 = vector.multi_reduction <maximumf>, %150, %cst_75 [1] : vector<4x128xf32> to vector<4xf32>
    %152 = vector.shape_cast %151 : vector<4xf32> to vector<4x1xf32>
    %153 = vector.broadcast %152 : vector<4x1xf32> to vector<4x128xf32>
    %154 = arith.subf %150, %153 : vector<4x128xf32>
    %155 = math.exp %154 : vector<4x128xf32>
    %cst_76 = arith.constant dense<0.000000e+00> : vector<4xf32>
    %156 = vector.multi_reduction <add>, %155, %cst_76 [1] : vector<4x128xf32> to vector<4xf32>
    %157 = vector.shape_cast %156 : vector<4xf32> to vector<4x1xf32>
    %158 = math.log %157 : vector<4x1xf32>
    %159 = arith.addf %152, %158 : vector<4x1xf32>
    %160 = vector.broadcast %159 : vector<4x1xf32> to vector<4x128xf32>
    %161 = arith.subf %150, %160 : vector<4x128xf32>
    %c0_77 = arith.constant 0 : index
    %c0_78 = arith.constant 0 : index
    %162 = vector.load %arg11[%c0_77, %c0_78] : memref<4x128xf32, #tpu.memory_space<vmem>>, vector<4x128xf32>
    tpu.vector_store %arg11[%c0_77, %c0_78], %161 {strides = array<i32>} : memref<4x128xf32, #tpu.memory_space<vmem>>, vector<4x128xf32>,
    return
  }
}

</mosaic_0001>

<bundles_post_ra>
// kernel: tpu_custom_call.1
= control target key start
LH: loop header
LB: loop body
LE: loop exit
PB: predicated region body
PF: predicated region fallthrough
CT: control target
= control target key end

     0   :  { %19 = vsyncpa [#allocation3], 0  ;;  %s2423_s0 = inlined_call_operand.hbm [shape: f32[4,32], index: 0, kind: input, shape index: {}]   ;;  %s2424_s1 = inlined_call_operand.hbm [shape: f32[4,32], index: 1, kind: input, shape index: {}]   ;;  %s2425_s2 = inlined_call_operand.hbm [shape: f32[3,4,8,32], index: 2, kind: input, shape index: {}]   ;;  %s2426_s3 = inlined_call_operand.hbm [shape: f32[3,4,8,32], index: 3, kind: input, shape index: {}]   ;;  %s2427_s4 = inlined_call_operand.vmem [shape: f32[3,32], index: 4, kind: input, shape index: {}]   ;;  %s2428_s5 = inlined_call_operand.hbm [shape: f32[32,192], index: 5, kind: input, shape index: {}]   ;;  %s2429_s6 = inlined_call_operand.hbm [shape: f32[32,96], index: 6, kind: input, shape index: {}]   ;;  %s2430_s7 = inlined_call_operand.hbm [shape: f32[32,224], index: 7, kind: input, shape index: {}]   ;;  %s2431_s8 = inlined_call_operand.hbm [shape: f32[32,128], index: 8, kind: input, shape index: {}]   ;;  %s2432_s9 = inlined_call_operand.vmem [shape: f32[2,96], index: 9, kind: input, shape index: {}]   ;;  %s2433_s10 = inlined_call_operand.vmem [shape: f32[1,128], index: 10, kind: input, shape index: {}]   ;;  %s2434_s11 = inlined_call_operand.hbm [shape: f32[4,128], index: 11, kind: output, shape index: {0}]   ;;  %s2435_s12 = inlined_call_operand.hbm [shape: f32[4,32], index: 12, kind: output, shape index: {1}]   ;;  %s2436_s13 = inlined_call_operand.hbm [shape: f32[3,4,8], index: 13, kind: output, shape index: {2}]  }
   0x1   :  { %20 = vsyncpa [#allocation6], 0 }
   0x2   :  { %21 = vsyncpa [#allocation9], 0 }
   0x3   :  { %22 = vsyncpa [#allocation12], 0 }
   0x4   :  { %23 = vsyncpa [#allocation15], 0 }
   0x5   :  { %24 = vsyncpa [#allocation4], 0 }
   0x6   :  { %25 = vsyncpa [#allocation18], 0  ;;  %s1889_s25 = smov [#allocation5]   ;;  %s1633_s29 = scalar_lea.hbm %s2424_s1, 64 }
   0x7   :  { %s42_s26 = sshll.u32 %s1889_s25, 4  ;;  %p1634_p0 = scmp.ne.s32.totalorder %s2424_s1, %s1633_s29  ;;  %s43_s26 = int_to_ptr.vmem [resolvable:$true] %s42_s26 }
   0x8   :  { %p1637_p1 = scmp.lt.u32.totalorder %s1633_s29, %s2424_s1 }
   0xa   :  { %p1639_p2 = pnand %p1637_p1, %p1634_p0 }
   0xc   :  { %1642 = shalt.err (!%p1639_p2)
}
   0xd   :  { %s1643_s17 = scalar_lea.vmem %s43_s26, 64  ;;  %p1648_p4 = scmp.lt.s32.totalorder %s43_s26, %s43_s26 }
   0xe   :  { %p1644_p3 = scmp.ne.s32.totalorder %s43_s26, %s1643_s17  ;;  %p1649_p5 = scmp.lt.s32.totalorder %s1643_s17, %s1643_s17 }
  0x10   :  { %p1650_p6 = por %p1649_p5, %p1648_p4 }
  0x12   :  { %p1651_p7 = pnand %p1650_p6, %p1644_p3 }
  0x14   :  { %1654 = shalt.err (!%p1651_p7)
}
  0x15   :  { %45 = dma.hbm_to_vmem [thread:$0]  %s2424_s1, 64, %s43_s26, [#allocation6]  }
  0x16   :  { %s1890_s20 = smov [#allocation8]   ;;  %s1891_s22 = smov [#allocation11]  }
  0x17   :  { %s63_s21 = sshll.u32 %s1890_s20, 4  ;;  %s89_s23 = sshll.u32 %s1891_s22, 4  ;;  %s64_s21 = int_to_ptr.vmem [resolvable:$true] %s63_s21  ;;  %s90_s23 = int_to_ptr.vmem [resolvable:$true] %s89_s23 }
  0x18   :  { %s1655_s27 = scalar_lea.hbm %s2426_s3, 1536 }
  0x19   :  { %p1656_p8 = scmp.ne.s32.totalorder %s2426_s3, %s1655_s27  ;;  %p1659_p9 = scmp.lt.u32.totalorder %s1655_s27, %s2426_s3 }
  0x1b   :  { %p1661_p10 = pnand %p1659_p9, %p1656_p8 }
  0x1d   :  { %1664 = shalt.err (!%p1661_p10)
}
  0x1e   :  { %s1665_s1 = scalar_lea.vmem %s64_s21, 1536  ;;  %p1670_p12 = scmp.lt.s32.totalorder %s64_s21, %s64_s21 }
  0x1f   :  { %p1666_p11 = scmp.ne.s32.totalorder %s64_s21, %s1665_s1  ;;  %p1671_p13 = scmp.lt.s32.totalorder %s1665_s1, %s1665_s1 }
  0x21   :  { %p1672_p0 = por %p1671_p13, %p1670_p12 }
  0x23   :  { %p1673_p1 = pnand %p1672_p0, %p1666_p11 }
  0x25   :  { %1676 = shalt.err (!%p1673_p1)
}
  0x26   :  { %s1892_s26 = smov 128   ;;  %s1893_s15 = smov 8  }
  0x27   :  { %69 = dma.hbm_to_vmem [thread:$0]  %s2426_s3, 1536, %s64_s21, [#allocation9], %s1892_s26, %s1892_s26, %s1893_s15  }
  0x28   :  { %s1677_s20 = scalar_lea.hbm %s2429_s6, 512 }
  0x29   :  { %p1678_p2 = scmp.ne.s32.totalorder %s2429_s6, %s1677_s20  ;;  %p1681_p3 = scmp.lt.u32.totalorder %s1677_s20, %s2429_s6 }
  0x2b   :  { %p1683_p4 = pnand %p1681_p3, %p1678_p2 }
  0x2d   :  { %1686 = shalt.err (!%p1683_p4)
}
  0x2e   :  { %s1687_s28 = scalar_lea.vmem %s90_s23, 512  ;;  %p1692_p6 = scmp.lt.s32.totalorder %s90_s23, %s90_s23 }
  0x2f   :  { %p1688_p5 = scmp.ne.s32.totalorder %s90_s23, %s1687_s28  ;;  %p1693_p7 = scmp.lt.s32.totalorder %s1687_s28, %s1687_s28 }
  0x31   :  { %p1694_p8 = por %p1693_p7, %p1692_p6 }
  0x33   :  { %p1695_p9 = pnand %p1694_p8, %p1688_p5 }
  0x35   :  { %1698 = shalt.err (!%p1695_p9)
}
  0x36   :  { %95 = dma.hbm_to_vmem [thread:$0]  %s2429_s6, 512, %s90_s23, [#allocation12], %s1892_s26, %s1892_s26, %s1893_s15  }
  0x37   :  { %s1894_s29 = smov [#allocation2]   ;;  %s1895_s14 = smov [#allocation7]  }
  0x38   :  { %s32_s30 = sshll.u32 %s1894_s29, 4  ;;  %s51_s1 = sshll.u32 %s1895_s14, 4  ;;  %s33_s30 = int_to_ptr.vmem [resolvable:$true] %s32_s30  ;;  %s52_s1 = int_to_ptr.vmem [resolvable:$true] %s51_s1 }
  0x39   :  { %s1699_s18 = scalar_lea.hbm %s2423_s0, 64 }
  0x3a   :  { %p1700_p10 = scmp.ne.s32.totalorder %s2423_s0, %s1699_s18  ;;  %p1703_p11 = scmp.lt.u32.totalorder %s1699_s18, %s2423_s0 }
  0x3c   :  { %p1705_p12 = pnand %p1703_p11, %p1700_p10 }
  0x3e   :  { %1708 = shalt.err (!%p1705_p12)
}
  0x3f   :  { %s1709_s6 = scalar_lea.vmem %s33_s30, 64  ;;  %p1714_p0 = scmp.lt.s32.totalorder %s33_s30, %s33_s30 }
  0x40   :  { %p1710_p13 = scmp.ne.s32.totalorder %s33_s30, %s1709_s6  ;;  %p1715_p1 = scmp.lt.s32.totalorder %s1709_s6, %s1709_s6 }
  0x42   :  { %p1716_p2 = por %p1715_p1, %p1714_p0 }
  0x44   :  { %p1717_p3 = pnand %p1716_p2, %p1710_p13 }
  0x46   :  { %1720 = shalt.err (!%p1717_p3)
}
  0x47   :  { %35 = dma.hbm_to_vmem [thread:$0]  %s2423_s0, 64, %s33_s30, [#allocation3]  }
  0x48   :  { %s1721_s3 = scalar_lea.hbm %s2425_s2, 1536 }
  0x49   :  { %p1722_p4 = scmp.ne.s32.totalorder %s2425_s2, %s1721_s3  ;;  %p1725_p5 = scmp.lt.u32.totalorder %s1721_s3, %s2425_s2 }
  0x4b   :  { %p1727_p6 = pnand %p1725_p5, %p1722_p4 }
  0x4d   :  { %1730 = shalt.err (!%p1727_p6)
}
  0x4e   :  { %s1731_s17 = scalar_lea.vmem %s52_s1, 1536  ;;  %p1736_p8 = scmp.lt.s32.totalorder %s52_s1, %s52_s1 }
  0x4f   :  { %p1732_p7 = scmp.ne.s32.totalorder %s52_s1, %s1731_s17  ;;  %p1737_p9 = scmp.lt.s32.totalorder %s1731_s17, %s1731_s17 }
  0x51   :  { %p1738_p10 = por %p1737_p9, %p1736_p8 }
  0x53   :  { %p1739_p11 = pnand %p1738_p10, %p1732_p7 }
  0x55   :  { %1742 = shalt.err (!%p1739_p11)
}
  0x56   :  { %57 = dma.hbm_to_vmem [thread:$0]  %s2425_s2, 1536, %s52_s1, [#allocation6], %s1892_s26, %s1892_s26, %s1893_s15  }
  0x57   :  { %s1896_s18 = smov [#allocation10]   ;;  %s1743_s24 = scalar_lea.hbm %s2428_s5, 1024 }
  0x58   :  { %s77_s19 = sshll.u32 %s1896_s18, 4  ;;  %p1744_p12 = scmp.ne.s32.totalorder %s2428_s5, %s1743_s24  ;;  %s78_s19 = int_to_ptr.vmem [resolvable:$true] %s77_s19 }
  0x59   :  { %p1747_p13 = scmp.lt.u32.totalorder %s1743_s24, %s2428_s5 }
  0x5b   :  { %p1749_p0 = pnand %p1747_p13, %p1744_p12 }
  0x5d   :  { %1752 = shalt.err (!%p1749_p0)
}
  0x5e   :  { %s1753_s28 = scalar_lea.vmem %s78_s19, 1024  ;;  %p1758_p2 = scmp.lt.s32.totalorder %s78_s19, %s78_s19 }
  0x5f   :  { %p1754_p1 = scmp.ne.s32.totalorder %s78_s19, %s1753_s28  ;;  %p1759_p3 = scmp.lt.s32.totalorder %s1753_s28, %s1753_s28 }
  0x61   :  { %p1760_p4 = por %p1759_p3, %p1758_p2 }
  0x63   :  { %p1761_p5 = pnand %p1760_p4, %p1754_p1 }
  0x65   :  { %1764 = shalt.err (!%p1761_p5)
}
  0x66   :  { %s1897_s2 = smov 256   ;;  %s1898_s1 = smov 16  }
  0x67   :  { %83 = dma.hbm_to_vmem [thread:$0]  %s2428_s5, 1024, %s78_s19, [#allocation9], %s1897_s2, %s1897_s2, %s1898_s1  }
  0x68   :  { %s1899_s29 = smov [#allocation13]   ;;  %s1900_s16 = smov [#allocation14]  }
  0x69   :  { %s101_s14 = sshll.u32 %s1899_s29, 4  ;;  %s113_s17 = sshll.u32 %s1900_s16, 4  ;;  %s102_s14 = int_to_ptr.vmem [resolvable:$true] %s101_s14  ;;  %s2064_s17 = int_to_ptr.vmem [resolvable:$true] %s113_s17 }
  0x6a   :  { %s1765_s18 = scalar_lea.hbm %s2430_s7, 1024 }
  0x6b   :  { %p1766_p6 = scmp.ne.s32.totalorder %s2430_s7, %s1765_s18  ;;  %p1769_p7 = scmp.lt.u32.totalorder %s1765_s18, %s2430_s7 }
  0x6d   :  { %p1771_p8 = pnand %p1769_p7, %p1766_p6 }
  0x6f   :  { %1774 = shalt.err (!%p1771_p8)
}
  0x70   :  { %s1775_s5 = scalar_lea.vmem %s102_s14, 1024  ;;  %p1780_p10 = scmp.lt.s32.totalorder %s102_s14, %s102_s14 }
  0x71   :  { %p1776_p9 = scmp.ne.s32.totalorder %s102_s14, %s1775_s5  ;;  %p1781_p11 = scmp.lt.s32.totalorder %s1775_s5, %s1775_s5 }
  0x73   :  { %p1782_p12 = por %p1781_p11, %p1780_p10 }
  0x75   :  { %p1783_p13 = pnand %p1782_p12, %p1776_p9 }
  0x77   :  { %1786 = shalt.err (!%p1783_p13)
}
  0x78   :  { %107 = dma.hbm_to_vmem [thread:$0]  %s2430_s7, 1024, %s102_s14, [#allocation12], %s1897_s2, %s1897_s2, %s1898_s1  }
  0x79   :  { %s1787_s28 = scalar_lea.hbm %s2431_s8, 512 }
  0x7a   :  { %p1788_p0 = scmp.ne.s32.totalorder %s2431_s8, %s1787_s28  ;;  %p1791_p1 = scmp.lt.u32.totalorder %s1787_s28, %s2431_s8 }
  0x7c   :  { %p1793_p2 = pnand %p1791_p1, %p1788_p0 }
  0x7e   :  { %1796 = shalt.err (!%p1793_p2)
}
  0x7f   :  { %s1797_s0 = scalar_lea.vmem %s2064_s17, 512  ;;  %p1802_p4 = scmp.lt.s32.totalorder %s2064_s17, %s2064_s17 }
  0x80   :  { %p1798_p3 = scmp.ne.s32.totalorder %s2064_s17, %s1797_s0  ;;  %p1803_p5 = scmp.lt.s32.totalorder %s1797_s0, %s1797_s0 }
  0x82   :  { %p1804_p6 = por %p1803_p5, %p1802_p4 }
  0x84   :  { %p1805_p7 = pnand %p1804_p6, %p1798_p3 }
  0x86   :  { %1808 = shalt.err (!%p1805_p7)
}
  0x87   :  { %119 = dma.hbm_to_vmem [thread:$0]  %s2431_s8, 512, %s2064_s17, [#allocation15], %s1892_s26, %s1892_s26, %s1893_s15  }
  0x88   :  { %1875 = dma.done.wait [#allocation3], 64  }
  0x89   :  { %1876 = vsyncadd [#allocation3], 4294967232 }
  0x8a   :  { %1877 = dma.done.wait [#allocation6], 1600  }
  0x8b   :  { %1878 = vsyncadd [#allocation6], 4294965696 }
  0x8c   :  { %1879 = dma.done.wait [#allocation9], 2560  }
  0x8d   :  { %1880 = vsyncadd [#allocation9], 4294964736 }
  0x8e   :  { %1881 = dma.done.wait [#allocation12], 1536  }
  0x8f   :  { %1882 = vsyncadd [#allocation12], 4294965760 }
  0x90   :  { %1883 = dma.done.wait [#allocation15], 512  }
  0x91   :  { %1884 = vsyncadd [#allocation15], 4294966784  ;;  %v1901_v0 = vmov 0.0   ;;  %v151_v1 = vld [vmem:[#allocation10 + $0x8] sm:$0xff]  ;;  %v153_v2 = vld [vmem:[#allocation10 + $0x18] sm:$0xff]  ;;  %s1902_s8 = smov 32   ;;  %v257_v27 = vlaneseq }
  0x92   :  { %226 = vmatprep.mubr.f32.mxu0 %v1901_v0  ;;  %1186 = vmatprep.mubr.f32.mxu1 %v1901_v0  ;;  %v150_v3 = vld [vmem:[#allocation10] sm:$0xff]  ;;  %v1516_v4 = vpack.c.bf16 %v153_v2, %v151_v1  ;;  %v152_v5 = vld [vmem:[#allocation10 + $0x10] sm:$0xff]  ;;  %v155_v6 = vld [vmem:[#allocation10 + $0x28] sm:$0xff]  ;;  %vm158_vm0 = vcmask 261120   ;;  %s1903_s1 = smov 64   ;;  %s1905_s30 = smov 96  }
  0x93   :  { %v157_v7 = vld [vmem:[#allocation10 + $0x38] sm:$0xff]  ;;  %v1518_v8 = vpack.c.bf16 %v152_v5, %v150_v3  ;;  %v154_v10 = vld [vmem:[#allocation10 + $0x20] sm:$0xff]  ;;  %v156_v11 = vld [vmem:[#allocation10 + $0x30] sm:$0xff]  ;;  %v1904_v25 = vmov 1966171168   ;;  %v2118_v30 = vshrl.u32 %v257_v27, 7 }
  0x94   :  { %v1520_v9 = vpack.c.bf16 %v157_v7, %v155_v6  ;;  %1517 = vmatprep.subr.bf16.mxu0 %v1516_v4  ;;  %v528_v12 = vld [vmem:[#allocation8 + $0x30] sm:$0xff]  ;;  %v526_v13 = vld [vmem:[#allocation8 + $0x20] sm:$0xff]  ;;  %v1522_v14 = vpack.c.bf16 %v156_v11, %v154_v10  ;;  %v529_v15 = vld [vmem:[#allocation8 + $0x38] sm:$0xff]  ;;  %v255_v26 = vunpack.c.l.s4 %v1904_v25  ;;  %vm348_vm1 = vcmask 1041409   ;;  %s1909_s19 = smov [#allocation17]  }
  0x95   :  { %1519 = vmatpush1.bf16.msra.mxu0 %v1518_v8  ;;  %539 = vrot.lane.b32.xlu1 %v528_v12, %s1902_s8  ;;  %v527_v16 = vld [vmem:[#allocation8 + $0x28] sm:$0xff]  ;;  %v149_v17 = vld [vmem:[#allocation5] sm:$0xf]  ;;  %v789_v18 = vld [vmem:[#allocation8 + $0x40] sm:$0xff]  ;;  %v2125_v36 = vsub.s32 0, %v2118_v30  ;;  %vm350_vm2 = vcmask 1042434  }
  0x96   :  { %1521 = vmatprep.subr.bf16.mxu0 %v1520_v9  ;;  %535 = vrot.lane.b32.xlu0 %v526_v13, %s1902_s8  ;;  %v1475_v19 = vld [vmem:[%s2427_s4 + $0x1] ss:$0 sm:$0xff]  ;;  %v791_v20 = vld [vmem:[#allocation8 + $0x50] sm:$0xff]  ;;  %v790_v21 = vld [vmem:[#allocation8 + $0x48] sm:$0xff]  ;;  %v256_v29 = vunpack.c.0.s8 %v255_v26  ;;  %vm352_vm3 = vcmask 1043459   ;;  %vm355_vm4 = vcmask 60416  }
  0x97   :  { %v1476_v22 = vld [vmem:[%s2427_s4 + $0x2] ss:$0 sm:$0xff]  ;;  %vm1908_vm5 = vmmov 0   ;;  %vm1323_vm6 = vcmask 257024   ;;  %vm1409_vm7 = vcmask 1043456   ;;  %s1440_s23 = sshll.u32 %s1909_s19, 4  ;;  %s1441_s23 = int_to_ptr.vmem [resolvable:$true] %s1440_s23 }
  0x98   :  { %v792_v23 = vld [vmem:[#allocation8 + $0x58] sm:$0xff]  ;;  %v259_v33 = vsub.s32 %v256_v29, %v2118_v30  ;;  %s1809_s25 = scalar_lea.vmem %s1441_s23, 64  ;;  %p1814_p9 = scmp.lt.s32.totalorder %s1441_s23, %s1441_s23 }
  0x99   :  { %1523 = vmatpush1.bf16.msra.mxu0 %v1522_v14  ;;  %541 = vrot.lane.b32.xlu1 %v529_v15, %s1902_s8  ;;  %v248_v14 = vld [vmem:[#allocation8] sm:$0xff]  ;;  %v251_v25 = vld [vmem:[#allocation8 + $0x18] sm:$0xff]  ;;  %p1810_p8 = scmp.ne.s32.totalorder %s1441_s23, %s1809_s25  ;;  %p1815_p10 = scmp.lt.s32.totalorder %s1809_s25, %s1809_s25 }
  0x9a   :  { %537 = vrot.lane.b32.xlu0 %v527_v16, %s1902_s8 }
  0x9b   :  { %p1816_p11 = por %p1815_p10, %p1814_p9 }
  0x9c   :  { %1472 = vmatmul.mubr.msk.f32.vlgmr.msra.gmra.mrb[0].mxu0 %vm158_vm0, %v149_v17  ;;  %v249_v17 = vld [vmem:[#allocation8 + $0x8] sm:$0xff] }
  0x9d   :  { %798 = vrot.lane.b32.xlu1 %v789_v18, %s1903_s1  ;;  %v1474_v18 = vld [vmem:[%s2427_s4] ss:$0 sm:$0xff]  ;;  %1502 = vmatprep.mubr.msk.f32.mxu0 %vm1908_vm5, %v1901_v0  ;;  %p1817_p12 = pnand %p1816_p11, %p1810_p8 }
  0x9e   :  { %560 = vrot.lane.b32.xlu0 %v1475_v19, %s1902_s8 }
  0xa1   :  { %802 = vrot.lane.b32.xlu1 %v791_v20, %s1903_s1 }
  0xa2   :  { %800 = vrot.lane.b32.xlu0 %v790_v21, %s1903_s1  ;;  %v250_v21 = vld [vmem:[#allocation8 + $0x10] sm:$0xff] }
  0xa5   :  { %823 = vrot.lane.b32.xlu1 %v1476_v22, %s1903_s1 }
  0xa6   :  { %804 = vrot.lane.b32.xlu0 %v792_v23, %s1903_s1 }
 0x107   :  { %v540_v24 = vpop.permute.xlu1 %539 }
 0x108   :  { %v536_v28 = vpop.permute.xlu0 %535 }
 0x10b   :  { %v542_v31 = vpop.permute.xlu1 %541 }
 0x10c   :  { %v538_v32 = vpop.permute.xlu0 %537 }
 0x10f   :  { %v799_v38 = vpop.permute.xlu1 %798 }
 0x110   :  { %v561_v41 = vpop.permute.xlu0 %560 }
 0x113   :  { %v803_v45 = vpop.permute.xlu1 %802 }
 0x114   :  { %v801_v51 = vpop.permute.xlu0 %800 }
 0x117   :  { %v824_v60 = vpop.permute.xlu1 %823 }
 0x118   :  { %v805_v1 = vpop.permute.xlu0 %804 }
 0x16f   :  { %v2121_v34 = vpop.f32.mrb[0].mxu0 }
 0x170   :  { %v260_v35 = vrot.slane %v2121_v34, %v259_v33  ;;  %v2127_v37 = vpop.f32.mrb[1].mxu0 }
 0x172   :  { %v261_v39 = vcombine.high %v260_v35, %v260_v35  ;;  %v268_v40 = vrot.slane %v260_v35, %v259_v33 }
 0x174   :  { %v275_v42 = vrot.slane %v261_v39, %v259_v33  ;;  %v276_v43 = vcombine.high %v268_v40, %v268_v40  ;;  %v281_v44 = vrot.slane %v268_v40, %v2125_v36 }
 0x176   :  { %v285_v46 = vrot.slane %v275_v42, %v2125_v36  ;;  %v277_v47 = vcombine.high %v275_v42, %v275_v42  ;;  %v810_v48 = vadd.f32 %v799_v38, %v281_v44  ;;  %v289_v49 = vrot.slane %v276_v43, %v2125_v36 }
 0x177   :  { %v547_v50 = vadd.f32 %v536_v28, %v281_v44  ;;  %v298_v15 = vadd.f32 %v281_v44, %v248_v14 }
 0x178   :  { %v811_v52 = vadd.f32 %v801_v51, %v285_v46  ;;  %v293_v53 = vrot.slane %v277_v47, %v2125_v36  ;;  %v548_v55 = vadd.f32 %v538_v32, %v285_v46  ;;  %v814_v56 = vmax.f32 %v810_v48, 0.0 }
 0x179   :  { %v551_v54 = vmax.f32 %v547_v50, 0.0  ;;  %v549_v59 = vadd.f32 %v540_v24, %v289_v49  ;;  %v812_v2 = vadd.f32 %v803_v45, %v289_v49  ;;  %v302_v16 = vmax.f32 %v298_v15, 0.0 }
 0x17a   :  { %v552_v58 = vmax.f32 %v548_v55, 0.0  ;;  %v815_v61 = vmax.f32 %v811_v52, 0.0  ;;  %v550_v63 = vadd.f32 %v542_v31, %v293_v53  ;;  %v826_v3 = vmul.f32 %v824_v60, %v814_v56 }
 0x17b   :  { %v563_v57 = vmul.f32 %v561_v41, %v551_v54  ;;  %v553_v4 = vmax.f32 %v549_v59, 0.0  ;;  %v813_v5 = vadd.f32 %v805_v1, %v293_v53  ;;  %v816_v8 = vmax.f32 %v812_v2, 0.0 }
 0x17c   :  { %v564_v62 = vmul.f32 %v561_v41, %v552_v58  ;;  %v827_v6 = vmul.f32 %v824_v60, %v815_v61  ;;  %v554_v7 = vmax.f32 %v550_v63, 0.0  ;;  %v299_v19 = vadd.f32 %v285_v46, %v249_v17 }
 0x17d   :  { %571 = vrot.lane.b32.xlu0 %v563_v57, %s1905_s30  ;;  %v565_v9 = vmul.f32 %v561_v41, %v553_v4  ;;  %v817_v10 = vmax.f32 %v813_v5, 0.0  ;;  %v828_v12 = vmul.f32 %v824_v60, %v816_v8  ;;  %v310_v20 = vmul.f32 %v1474_v18, %v302_v16 }
 0x17e   :  { %573 = vrot.lane.b32.xlu1 %v564_v62, %s1905_s30  ;;  %v566_v11 = vmul.f32 %v561_v41, %v554_v7  ;;  %v303_v22 = vmax.f32 %v299_v19, 0.0  ;;  %v300_v23 = vadd.f32 %v289_v49, %v250_v21  ;;  %v301_v29 = vadd.f32 %v293_v53, %v251_v25 }
 0x17f   :  { %v829_v13 = vmul.f32 %v824_v60, %v817_v10  ;;  %v314_v24 = vsel %vm158_vm0, %v310_v20, 0.0  ;;  %v331_v56 = vand.u32 127, %v257_v27 }
 0x180   :  { %v311_v26 = vmul.f32 %v1474_v18, %v303_v22  ;;  %v304_v28 = vmax.f32 %v300_v23, 0.0  ;;  %v305_v33 = vmax.f32 %v301_v29, 0.0 }
 0x181   :  { %834 = vrot.lane.b32.xlu0 %v826_v3, %s1903_s1  ;;  %v2158_v58 = vsub.s32 %v331_v56, %v2118_v30 }
 0x182   :  { %836 = vrot.lane.b32.xlu1 %v827_v6, %s1903_s1  ;;  %v317_v31 = vsel %vm158_vm0, %v311_v26, 0.0  ;;  %v312_v32 = vmul.f32 %v1474_v18, %v304_v28  ;;  %v313_v38 = vmul.f32 %v1474_v18, %v305_v33  ;;  %v1906_v6 = vmov 0  }
 0x183   :  { %1569 = vset.pattern.permute.xlu1 %v1906_v6  ;;  %1568 = vset.pattern.permute.xlu0 %v1906_v6  ;;  %v2197_v33 = vsub.s32 1, %v2118_v30 }
 0x184   :  { %v320_v35 = vsel %vm158_vm0, %v312_v32, 0.0  ;;  %v323_v39 = vsel %vm158_vm0, %v313_v38, 0.0  ;;  %v2203_v38 = vsub.s32 3, %v2118_v30 }
 0x185   :  { %575 = vrot.lane.b32.xlu0 %v565_v9, %s1905_s30 }
 0x186   :  { %577 = vrot.lane.b32.xlu1 %v566_v11, %s1905_s30 }
 0x189   :  { %838 = vrot.lane.b32.xlu0 %v828_v12, %s1903_s1 }
 0x18a   :  { %840 = vrot.lane.b32.xlu1 %v829_v13, %s1903_s1 }
 0x1a8   :  { %315 = vadd.xlane.f32.xlu0 %v314_v24 }
 0x1ae   :  { %318 = vadd.xlane.f32.xlu1 %v317_v31 }
 0x1b2   :  { %321 = vadd.xlane.f32.xlu1 %v320_v35  ;;  %v2200_v35 = vsub.s32 2, %v2118_v30 }
 0x1b6   :  { %324 = vadd.xlane.f32.xlu1 %v323_v39 }
 0x1ef   :  { %v572_v40 = vpop.permute.xlu0 %571 }
 0x1f0   :  { %v583_v41 = vsel %vm158_vm0, %v572_v40, 0.0  ;;  %v574_v42 = vpop.permute.xlu1 %573 }
 0x1f1   :  { %584 = vadd.xlane.f32.xlu0 %v583_v41  ;;  %v586_v44 = vsel %vm158_vm0, %v574_v42, 0.0 }
 0x1f3   :  { %v835_v43 = vpop.permute.xlu0 %834 }
 0x1f4   :  { %v846_v45 = vsel %vm158_vm0, %v835_v43, 0.0  ;;  %v837_v46 = vpop.permute.xlu1 %836 }
 0x1f5   :  { %587 = vadd.xlane.f32.xlu0 %v586_v44  ;;  %847 = vadd.xlane.f32.xlu1 %v846_v45  ;;  %v849_v51 = vsel %vm158_vm0, %v837_v46, 0.0 }
 0x1f7   :  { %v576_v47 = vpop.permute.xlu0 %575 }
 0x1f8   :  { %v589_v48 = vsel %vm158_vm0, %v576_v47, 0.0  ;;  %v578_v49 = vpop.permute.xlu1 %577 }
 0x1f9   :  { %590 = vadd.xlane.f32.xlu0 %v589_v48  ;;  %v592_v53 = vsel %vm158_vm0, %v578_v49, 0.0 }
 0x1fb   :  { %v839_v50 = vpop.permute.xlu0 %838 }
 0x1fc   :  { %v852_v52 = vsel %vm158_vm0, %v839_v50, 0.0  ;;  %v841_v54 = vpop.permute.xlu1 %840 }
 0x1fd   :  { %850 = vadd.xlane.f32.xlu0 %v849_v51  ;;  %853 = vadd.xlane.f32.xlu1 %v852_v52  ;;  %v855_v55 = vsel %vm158_vm0, %v841_v54, 0.0 }
 0x201   :  { %593 = vadd.xlane.f32.xlu0 %v592_v53 }
 0x205   :  { %856 = vadd.xlane.f32.xlu0 %v855_v55 }
 0x235   :  { %v316_v59 = vpop.xlane.xlu0 %315 }
 0x236   :  { %v335_v63 = vrot.slane %v316_v59, %v2158_v58 }
 0x23b   :  { %v319_v57 = vpop.xlane.xlu1 %318 }
 0x23c   :  { %v339_v61 = vrot.slane %v319_v57, %v2158_v58 }
 0x23e   :  { %v349_v27 = vsel %vm348_vm1, %v339_v61, %v335_v63 }
 0x23f   :  { %v322_v60 = vpop.xlane.xlu1 %321 }
 0x240   :  { %v343_v62 = vrot.slane %v322_v60, %v2158_v58 }
 0x242   :  { %v351_v3 = vsel %vm350_vm2, %v343_v62, %v349_v27 }
 0x243   :  { %v325_v1 = vpop.xlane.xlu1 %324 }
 0x244   :  { %v347_v2 = vrot.slane %v325_v1, %v2158_v58 }
 0x246   :  { %v353_v4 = vsel %vm352_vm3, %v347_v2, %v351_v3 }
 0x247   :  { %v356_v5 = vsel %vm355_vm4, %v353_v4, -inf }
 0x248   :  { %357 = vmax.xlane.f32.xlu1 %v356_v5 }
 0x27e   :  { %v585_v7 = vpop.xlane.xlu0 %584 }
 0x27f   :  { %v602_v14 = vrot.slane %v585_v7, %v2158_v58 }
 0x282   :  { %v588_v8 = vpop.xlane.xlu0 %587  ;;  %v2170_v10 = vpop.xlane.xlu1 %847 }
 0x283   :  { %v606_v12 = vrot.slane %v588_v8, %v2158_v58  ;;  %v865_v18 = vrot.slane %v2170_v10, %v2158_v58 }
 0x285   :  { %v615_v20 = vsel %vm348_vm1, %v606_v12, %v602_v14 }
 0x286   :  { %v2168_v9 = vpop.xlane.xlu0 %590 }
 0x287   :  { %v610_v13 = vrot.slane %v2168_v9, %v2158_v58 }
 0x289   :  { %v616_v22 = vsel %vm350_vm2, %v610_v13, %v615_v20 }
 0x28a   :  { %v2172_v11 = vpop.xlane.xlu0 %850  ;;  %v2180_v16 = vpop.xlane.xlu1 %853 }
 0x28b   :  { %v869_v15 = vrot.slane %v2172_v11, %v2158_v58  ;;  %v873_v21 = vrot.slane %v2180_v16, %v2158_v58 }
 0x28d   :  { %v878_v24 = vsel %vm348_vm1, %v869_v15, %v865_v18 }
 0x28e   :  { %v594_v17 = vpop.xlane.xlu0 %593  ;;  %v879_v29 = vsel %vm350_vm2, %v873_v21, %v878_v24 }
 0x28f   :  { %v614_v19 = vrot.slane %v594_v17, %v2158_v58 }
 0x291   :  { %v617_v23 = vsel %vm352_vm3, %v614_v19, %v616_v22 }
 0x292   :  { %v857_v25 = vpop.xlane.xlu0 %856  ;;  %v619_v26 = vsel %vm355_vm4, %v617_v23, -inf }
 0x293   :  { %v877_v28 = vrot.slane %v857_v25, %v2158_v58  ;;  %620 = vmax.xlane.f32.xlu0 %v619_v26 }
 0x295   :  { %v880_v31 = vsel %vm352_vm3, %v877_v28, %v879_v29 }
 0x296   :  { %v882_v32 = vsel %vm355_vm4, %v880_v31, -inf }
 0x297   :  { %883 = vmax.xlane.f32.xlu1 %v882_v32 }
 0x2d5   :  { %v358_v39 = vpop.xlane.xlu1 %357 }
 0x2d6   :  { %v363_v40 = vrot.slane %v358_v39, %v2125_v36  ;;  %v367_v41 = vrot.slane %v358_v39, %v2197_v33  ;;  %v371_v42 = vrot.slane %v358_v39, %v2200_v35  ;;  %v375_v45 = vrot.slane %v358_v39, %v2203_v38 }
 0x2d8   :  { %v380_v43 = vsub.f32 %v316_v59, %v363_v40  ;;  %v381_v44 = vsub.f32 %v319_v57, %v367_v41  ;;  %v382_v46 = vsub.f32 %v322_v60, %v371_v42  ;;  %v383_v49 = vsub.f32 %v325_v1, %v375_v45 }
 0x2da   :  { %v384_v47 = vmul.f32 1.442695, %v380_v43  ;;  %v386_v48 = vmul.f32 1.442695, %v381_v44  ;;  %v388_v50 = vmul.f32 1.442695, %v382_v46 }
 0x2db   :  { %v390_v30 = vmul.f32 1.442695, %v383_v49 }
 0x2dc   :  { %1570 = vpow2.f32 %v384_v47 }
 0x2dd   :  { %1572 = vpow2.f32 %v386_v48 }
 0x2de   :  { %1574 = vpow2.f32 %v388_v50 }
 0x2df   :  { %1576 = vpow2.f32 %v390_v30 }
 0x2e6   :  { %v2209_v51 = vpop.eup %1570 }
 0x2e7   :  { %v2211_v52 = vpop.eup %1572  ;;  %397 = vperm.xlu0 %1568, %v2209_v51  }
 0x2e8   :  { %400 = vperm.xlu1 %1569, %v2211_v52   ;;  %v2215_v53 = vpop.eup %1574 }
 0x2e9   :  { %v2218_v54 = vpop.eup %1576 }
 0x2ec   :  { %403 = vperm.xlu1 %1569, %v2215_v53  }
 0x2f0   :  { %406 = vperm.xlu1 %1569, %v2218_v54  }
 0x320   :  { %v621_v55 = vpop.xlane.xlu0 %620 }
 0x321   :  { %v626_v56 = vrot.slane %v621_v55, %v2125_v36  ;;  %v630_v57 = vrot.slane %v621_v55, %v2197_v33  ;;  %v634_v59 = vrot.slane %v621_v55, %v2200_v35  ;;  %v638_v27 = vrot.slane %v621_v55, %v2203_v38 }
 0x323   :  { %v643_v60 = vsub.f32 %v585_v7, %v626_v56  ;;  %v644_v61 = vsub.f32 %v588_v8, %v630_v57  ;;  %v645_v3 = vsub.f32 %v2168_v9, %v634_v59  ;;  %v646_v13 = vsub.f32 %v594_v17, %v638_v27 }
 0x324   :  { %v884_v62 = vpop.xlane.xlu1 %883 }
 0x325   :  { %v647_v63 = vmul.f32 1.442695, %v643_v60  ;;  %v893_v1 = vrot.slane %v884_v62, %v2197_v33  ;;  %v901_v2 = vrot.slane %v884_v62, %v2203_v38  ;;  %v649_v4 = vmul.f32 1.442695, %v644_v61 }
 0x326   :  { %v651_v7 = vmul.f32 1.442695, %v645_v3  ;;  %v889_v8 = vrot.slane %v884_v62, %v2125_v36  ;;  %v653_v15 = vmul.f32 1.442695, %v646_v13  ;;  %v897_v18 = vrot.slane %v884_v62, %v2200_v35 }
 0x327   :  { %1578 = vpow2.f32 %v647_v63  ;;  %v907_v5 = vsub.f32 %v2172_v11, %v893_v1  ;;  %v909_v6 = vsub.f32 %v857_v25, %v901_v2 }
 0x328   :  { %1580 = vpow2.f32 %v649_v4  ;;  %v906_v19 = vsub.f32 %v2170_v10, %v889_v8  ;;  %v908_v11 = vsub.f32 %v2180_v16, %v897_v18 }
 0x329   :  { %v912_v12 = vmul.f32 1.442695, %v907_v5  ;;  %v916_v14 = vmul.f32 1.442695, %v909_v6 }
 0x32a   :  { %v910_v17 = vmul.f32 1.442695, %v906_v19  ;;  %v914_v22 = vmul.f32 1.442695, %v908_v11 }
 0x32b   :  { %1582 = vpow2.f32 %v912_v12 }
 0x32c   :  { %1584 = vpow2.f32 %v651_v7 }
 0x32d   :  { %1586 = vpow2.f32 %v916_v14 }
 0x32e   :  { %1588 = vpow2.f32 %v653_v15 }
 0x32f   :  { %1590 = vpow2.f32 %v910_v17 }
 0x330   :  { %1592 = vpow2.f32 %v914_v22 }
 0x331   :  { %v2232_v9 = vpop.eup %1578 }
 0x332   :  { %660 = vperm.xlu1 %1569, %v2232_v9   ;;  %v2236_v20 = vpop.eup %1580 }
 0x335   :  { %v2238_v21 = vpop.eup %1582 }
 0x336   :  { %663 = vperm.xlu1 %1569, %v2236_v20   ;;  %926 = vperm.xlu0 %1568, %v2238_v21   ;;  %v2242_v10 = vpop.eup %1584 }
 0x337   :  { %v2244_v23 = vpop.eup %1586 }
 0x338   :  { %v2248_v16 = vpop.eup %1588 }
 0x339   :  { %v2251_v24 = vpop.eup %1590 }
 0x33a   :  { %666 = vperm.xlu1 %1569, %v2242_v10   ;;  %932 = vperm.xlu0 %1568, %v2244_v23   ;;  %v2254_v25 = vpop.eup %1592 }
 0x33e   :  { %669 = vperm.xlu1 %1569, %v2248_v16  }
 0x342   :  { %923 = vperm.xlu1 %1569, %v2251_v24  }
 0x346   :  { %929 = vperm.xlu1 %1569, %v2254_v25  }
 0x366   :  { %v398_v28 = vpop.permute.xlu0 %397 }
 0x367   :  { %v401_v26 = vpop.permute.xlu1 %400  ;;  %v411_v31 = vrot.slane %v398_v28, %v2158_v58 }
 0x368   :  { %v415_v32 = vrot.slane %v401_v26, %v2158_v58 }
 0x36a   :  { %v424_v41 = vsel %vm348_vm1, %v415_v32, %v411_v31 }
 0x36b   :  { %v404_v29 = vpop.permute.xlu1 %403 }
 0x36c   :  { %v419_v39 = vrot.slane %v404_v29, %v2158_v58 }
 0x36e   :  { %v425_v43 = vsel %vm350_vm2, %v419_v39, %v424_v41 }
 0x36f   :  { %v407_v40 = vpop.permute.xlu1 %406 }
 0x370   :  { %v423_v42 = vrot.slane %v407_v40, %v2158_v58 }
 0x372   :  { %v426_v44 = vsel %vm352_vm3, %v423_v42, %v425_v43 }
 0x373   :  { %v428_v45 = vsel %vm355_vm4, %v426_v44, 0.0 }
 0x374   :  { %429 = vadd.xlane.f32.xlu1 %v428_v45 }
 0x3b1   :  { %v661_v46 = vpop.permute.xlu1 %660 }
 0x3b2   :  { %v674_v30 = vrot.slane %v661_v46, %v2158_v58 }
 0x3b5   :  { %v664_v47 = vpop.permute.xlu1 %663  ;;  %v927_v56 = vpop.permute.xlu0 %926 }
 0x3b6   :  { %v678_v49 = vrot.slane %v664_v47, %v2158_v58  ;;  %v941_v27 = vrot.slane %v927_v56, %v2158_v58  ;;  %v1473_v56 = vld [vmem:[%s2432_s9 + $0x1] ss:$0 sm:$0xff] }
 0x3b8   :  { %v687_v57 = vsel %vm348_vm1, %v678_v49, %v674_v30 }
 0x3b9   :  { %v667_v48 = vpop.permute.xlu1 %666  ;;  %v933_v2 = vpop.permute.xlu0 %932 }
 0x3ba   :  { %v682_v50 = vrot.slane %v667_v48, %v2158_v58  ;;  %v949_v5 = vrot.slane %v933_v2, %v2158_v58  ;;  %v1110_v2 = vld [vmem:[#allocation13 + $0x28] sm:$0xff] }
 0x3bc   :  { %v688_v60 = vsel %vm350_vm2, %v682_v50, %v687_v57  ;;  %v1106_v57 = vld [vmem:[#allocation13 + $0x8] sm:$0xff] }
 0x3bd   :  { %v670_v55 = vpop.permute.xlu1 %669 }
 0x3be   :  { %v686_v59 = vrot.slane %v670_v55, %v2158_v58 }
 0x3c0   :  { %v689_v61 = vsel %vm352_vm3, %v686_v59, %v688_v60  ;;  %v1105_v60 = vld [vmem:[#allocation13] sm:$0xff] }
 0x3c1   :  { %v924_v62 = vpop.permute.xlu1 %923  ;;  %v691_v63 = vsel %vm355_vm4, %v689_v61, 0.0  ;;  %v1193_v61 = vld [vmem:[#allocation11] sm:$0xff] }
 0x3c2   :  { %692 = vadd.xlane.f32.xlu0 %v691_v63  ;;  %v937_v1 = vrot.slane %v924_v62, %v2158_v58  ;;  %v1194_v63 = vld [vmem:[#allocation11 + $0x8] sm:$0xff] }
 0x3c4   :  { %v950_v6 = vsel %vm348_vm1, %v941_v27, %v937_v1  ;;  %v1533_v1 = vpack.c.bf16 %v1194_v63, %v1193_v61  ;;  %v1112_v27 = vld [vmem:[#allocation13 + $0x38] sm:$0xff]  ;;  %v523_v61 = vld [vmem:[#allocation7 + $0x30] sm:$0xff] }
 0x3c5   :  { %v930_v3 = vpop.permute.xlu1 %929 }
 0x3c6   :  { %v945_v4 = vrot.slane %v930_v3, %v2158_v58  ;;  %v1109_v3 = vld [vmem:[#allocation13 + $0x20] sm:$0xff] }
 0x3c8   :  { %v951_v12 = vsel %vm350_vm2, %v945_v4, %v950_v6  ;;  %v1528_v4 = vpack.c.bf16 %v1112_v27, %v1110_v2  ;;  %v1196_v6 = vld [vmem:[#allocation11 + $0x18] sm:$0xff]  ;;  %v784_v27 = vld [vmem:[#allocation7 + $0x40] sm:$0xff] }
 0x3c9   :  { %v952_v13 = vsel %vm352_vm3, %v949_v5, %v951_v12  ;;  %v1195_v5 = vld [vmem:[#allocation11 + $0x10] sm:$0xff] }
 0x3ca   :  { %v954_v7 = vsel %vm355_vm4, %v952_v13, 0.0  ;;  %v1536_v13 = vpack.c.bf16 %v1196_v6, %v1195_v5 }
 0x3cb   :  { %955 = vadd.xlane.f32.xlu0 %v954_v7  ;;  %v148_v7 = vld [vmem:[#allocation2] sm:$0xf] }
 0x401   :  { %v430_v8 = vpop.xlane.xlu1 %429 }
 0x402   :  { %v435_v14 = vrot.slane %v430_v8, %v2125_v36  ;;  %v439_v15 = vrot.slane %v430_v8, %v2197_v33  ;;  %v443_v18 = vrot.slane %v430_v8, %v2200_v35  ;;  %v447_v19 = vrot.slane %v430_v8, %v2203_v38 }
 0x404   :  { %1594 = vrcp.f32 %v435_v14 }
 0x405   :  { %1596 = vrcp.f32 %v439_v15 }
 0x406   :  { %1598 = vrcp.f32 %v443_v18 }
 0x407   :  { %1600 = vrcp.f32 %v447_v19 }
 0x40e   :  { %v1595_v11 = vpop.eup %1594 }
 0x40f   :  { %v1597_v17 = vpop.eup %1596  ;;  %v453_v22 = vmul.f32 %v1595_v11, %v2209_v51 }
 0x410   :  { %v455_v26 = vmul.f32 %v1597_v17, %v2211_v52  ;;  %v1599_v28 = vpop.eup %1598 }
 0x411   :  { %462 = vperm.xlu1 %1569, %v453_v22   ;;  %v457_v29 = vmul.f32 %v1599_v28, %v2215_v53  ;;  %v1601_v31 = vpop.eup %1600 }
 0x412   :  { %467 = vperm.xlu0 %1568, %v455_v26   ;;  %v459_v32 = vmul.f32 %v1601_v31, %v2218_v54  ;;  %v244_v31 = vld [vmem:[#allocation7] sm:$0xff] }
 0x416   :  { %472 = vperm.xlu0 %1568, %v457_v29  }
 0x41a   :  { %477 = vperm.xlu0 %1568, %v459_v32   ;;  %v245_v32 = vld [vmem:[#allocation7 + $0x8] sm:$0xff] }
 0x44f   :  { %v693_v39 = vpop.xlane.xlu0 %692 }
 0x450   :  { %v698_v40 = vrot.slane %v693_v39, %v2125_v36  ;;  %v702_v41 = vrot.slane %v693_v39, %v2197_v33  ;;  %v706_v51 = vrot.slane %v693_v39, %v2200_v35  ;;  %v710_v52 = vrot.slane %v693_v39, %v2203_v38 }
 0x452   :  { %1602 = vrcp.f32 %v698_v40  ;;  %v246_v40 = vld [vmem:[#allocation7 + $0x10] sm:$0xff] }
 0x453   :  { %1604 = vrcp.f32 %v702_v41 }
 0x454   :  { %1606 = vrcp.f32 %v706_v51 }
 0x458   :  { %v956_v42 = vpop.xlane.xlu0 %955 }
 0x459   :  { %v961_v53 = vrot.slane %v956_v42, %v2125_v36  ;;  %v969_v43 = vrot.slane %v956_v42, %v2200_v35  ;;  %v965_v44 = vrot.slane %v956_v42, %v2197_v33  ;;  %v973_v47 = vrot.slane %v956_v42, %v2203_v38  ;;  %v247_v42 = vld [vmem:[#allocation7 + $0x18] sm:$0xff] }
 0x45b   :  { %1608 = vrcp.f32 %v961_v53 }
 0x45c   :  { %v1603_v54 = vpop.eup %1602  ;;  %1610 = vrcp.f32 %v710_v52 }
 0x45d   :  { %1612 = vrcp.f32 %v969_v43  ;;  %v716_v45 = vmul.f32 %v1603_v54, %v2232_v9  ;;  %v1605_v46 = vpop.eup %1604 }
 0x45e   :  { %1614 = vrcp.f32 %v965_v44  ;;  %v718_v48 = vmul.f32 %v1605_v46, %v2236_v20  ;;  %v1607_v49 = vpop.eup %1606 }
 0x45f   :  { %725 = vperm.xlu1 %1569, %v716_v45   ;;  %1616 = vrcp.f32 %v973_v47  ;;  %v720_v35 = vmul.f32 %v1607_v49, %v2242_v10 }
 0x463   :  { %730 = vperm.xlu1 %1569, %v718_v48  }
 0x465   :  { %v1609_v36 = vpop.eup %1608 }
 0x466   :  { %v1611_v50 = vpop.eup %1610  ;;  %v979_v30 = vmul.f32 %v1609_v36, %v2251_v24  ;;  %v521_v36 = vld [vmem:[#allocation7 + $0x20] sm:$0xff] }
 0x467   :  { %v1613_v33 = vpop.eup %1612  ;;  %735 = vperm.xlu1 %1569, %v720_v35   ;;  %v722_v9 = vmul.f32 %v1611_v50, %v2248_v16  ;;  %v1108_v16 = vld [vmem:[#allocation13 + $0x18] sm:$0xff] }
 0x468   :  { %988 = vperm.xlu0 %1568, %v979_v30   ;;  %v1615_v55 = vpop.eup %1614  ;;  %v983_v38 = vmul.f32 %v1613_v33, %v2254_v25  ;;  %v1524_v59 = vpack.c.bf16 %v1108_v16, %v1106_v57  ;;  %v1107_v25 = vld [vmem:[#allocation13 + $0x10] sm:$0xff] }
 0x469   :  { %v981_v20 = vmul.f32 %v1615_v55, %v2238_v21  ;;  %v1617_v10 = vpop.eup %1616  ;;  %v1526_v62 = vpack.c.bf16 %v1107_v25, %v1105_v60  ;;  %v1907_v21 = vmov 0.0|0.0  }
 0x46a   :  { %v985_v24 = vmul.f32 %v1617_v10, %v2244_v23  ;;  %1525 = vmatprep.subr.bf16.mxu1 %v1524_v59  ;;  %1532 = vmatprep.subr.bf16.mxu0 %v1907_v21  ;;  %v1111_v23 = vld [vmem:[#allocation13 + $0x30] sm:$0xff] }
 0x46b   :  { %740 = vperm.xlu1 %1569, %v722_v9   ;;  %1527 = vmatpush1.bf16.msra.mxu1 %v1526_v62  ;;  %v1530_v12 = vpack.c.bf16 %v1111_v23, %v1109_v3 }
 0x46c   :  { %998 = vperm.xlu0 %1568, %v983_v38   ;;  %1534 = vmatpush3.bf16.msra.mxu0 %v1533_v1  ;;  %v522_v38 = vld [vmem:[#allocation7 + $0x28] sm:$0xff] }
 0x46d   :  { %1529 = vmatprep.subr.bf16.mxu1 %v1528_v4  ;;  %1535 = vmatprep.subr.bf16.mxu0 %v1907_v21 }
 0x46f   :  { %993 = vperm.xlu1 %1569, %v981_v20   ;;  %1531 = vmatpush1.bf16.msra.mxu1 %v1530_v12 }
 0x470   :  { %239 = vrot.lane.b32.xlu0 %v1473_v56, %s1905_s30  ;;  %1537 = vmatpush3.bf16.msra.mxu0 %v1536_v13 }
 0x471   :  { %1538 = vmatprep.subr.bf16.mxu1 %v1907_v21 }
 0x473   :  { %1003 = vperm.xlu1 %1569, %v985_v24   ;;  %1503 = vmatmul.mubr.msk.f32.vlgmr.msra.gmra.mrb[2].mxu0 %vm158_vm0, %v148_v7 }
 0x490   :  { %v463_v14 = vpop.permute.xlu1 %462 }
 0x491   :  { %v468_v8 = vpop.permute.xlu0 %467  ;;  %v1045_v19 = vrot.slane %v463_v14, %v2158_v58  ;;  %v480_v39 = vmul.f32 %v463_v14, %v244_v31 }
 0x492   :  { %v1049_v18 = vrot.slane %v468_v8, %v2158_v58  ;;  %v481_v41 = vmul.f32 %v468_v8, %v245_v32 }
 0x493   :  { %v484_v51 = vsel %vm158_vm0, %v480_v39, 0.0 }
 0x494   :  { %v1090_v22 = vsel %vm348_vm1, %v1049_v18, %v1045_v19  ;;  %v491_v53 = vsel %vm158_vm0, %v481_v41, 0.0  ;;  %v485_v43 = vrot.slane %v484_v51, 4  ;;  %v524_v18 = vld [vmem:[#allocation7 + $0x38] sm:$0xff] }
 0x495   :  { %v473_v15 = vpop.permute.xlu0 %472  ;;  %v492_v45 = vrot.slane %v491_v53, 4 }
 0x496   :  { %v1053_v11 = vrot.slane %v473_v15, %v2158_v58  ;;  %v482_v52 = vmul.f32 %v473_v15, %v246_v40  ;;  %v486_v46 = vadd.f32 %v485_v43, %v484_v51 }
 0x497   :  { %v493_v49 = vadd.f32 %v492_v45, %v491_v53  ;;  %v785_v45 = vld [vmem:[#allocation7 + $0x48] sm:$0xff] }
 0x498   :  { %v1091_v28 = vsel %vm350_vm2, %v1053_v11, %v1090_v22  ;;  %v498_v54 = vsel %vm158_vm0, %v482_v52, 0.0  ;;  %v487_v35 = vrot.slane %v486_v46, 2 }
 0x499   :  { %v478_v17 = vpop.permute.xlu0 %477  ;;  %v499_v47 = vrot.slane %v498_v54, 4  ;;  %v494_v9 = vrot.slane %v493_v49, 2 }
 0x49a   :  { %v1057_v26 = vrot.slane %v478_v17, %v2158_v58  ;;  %v483_v44 = vmul.f32 %v478_v17, %v247_v42  ;;  %v488_v20 = vadd.f32 %v487_v35, %v486_v46 }
 0x49b   :  { %v500_v50 = vadd.f32 %v499_v47, %v498_v54  ;;  %v495_v59 = vadd.f32 %v494_v9, %v493_v49 }
 0x49c   :  { %v1092_v29 = vsel %vm352_vm3, %v1057_v26, %v1091_v28  ;;  %v505_v48 = vsel %vm158_vm0, %v483_v44, 0.0  ;;  %v489_v62 = vrot.slane %v488_v20, 1  ;;  %v786_v26 = vld [vmem:[#allocation7 + $0x50] sm:$0xff] }
 0x49d   :  { %1102 = vst.msk [vmem:[#allocation19] sm:$0xf] %vm355_vm4, %v1092_v29  ;;  %v506_v30 = vrot.slane %v505_v48, 4  ;;  %v501_v56 = vrot.slane %v500_v50, 2  ;;  %v496_v5 = vrot.slane %v495_v59, 1 }
 0x49e   :  { %v490_v19 = vadd.f32 %v489_v62, %v488_v20 }
 0x49f   :  { %v507_v10 = vadd.f32 %v506_v30, %v505_v48  ;;  %v502_v63 = vadd.f32 %v501_v56, %v500_v50  ;;  %v497_v46 = vadd.f32 %v496_v5, %v495_v59 }
 0x4a1   :  { %v508_v1 = vrot.slane %v507_v10, 2  ;;  %v503_v11 = vrot.slane %v502_v63, 1 }
 0x4a3   :  { %v2335_v17 = vadd.f32 %v508_v1, %v507_v10  ;;  %v504_v35 = vadd.f32 %v503_v11, %v502_v63 }
 0x4a5   :  { %v510_v56 = vrot.slane %v2335_v17, 1 }
 0x4de   :  { %v726_v33 = vpop.permute.xlu1 %725 }
 0x4df   :  { %v743_v55 = vmul.f32 %v726_v33, %v521_v36  ;;  %v1061_v7 = vrot.slane %v726_v33, %v2158_v58  ;;  %v2344_v36 = vmul.f32 0.5, %v490_v19 }
 0x4e1   :  { %v747_v24 = vsel %vm158_vm0, %v743_v55, 0.0 }
 0x4e2   :  { %v748_v57 = vrot.slane %v747_v24, 4  ;;  %v731_v16 = vpop.permute.xlu1 %730 }
 0x4e3   :  { %v744_v60 = vmul.f32 %v731_v16, %v522_v38  ;;  %v1065_v4 = vrot.slane %v731_v16, %v2158_v58 }
 0x4e4   :  { %v749_v25 = vadd.f32 %v748_v57, %v747_v24 }
 0x4e5   :  { %v754_v2 = vsel %vm158_vm0, %v744_v60, 0.0  ;;  %v1093_v29 = vsel %vm348_vm1, %v1065_v4, %v1061_v7 }
 0x4e6   :  { %v755_v3 = vrot.slane %v754_v2, 4  ;;  %v736_v23 = vpop.permute.xlu1 %735  ;;  %v750_v6 = vrot.slane %v749_v25, 2 }
 0x4e7   :  { %v745_v12 = vmul.f32 %v736_v23, %v523_v61  ;;  %v2330_v13 = vpop.permute.xlu0 %988  ;;  %v1069_v14 = vrot.slane %v736_v23, %v2158_v58 }
 0x4e8   :  { %v756_v8 = vadd.f32 %v755_v3, %v754_v2  ;;  %v1006_v15 = vmul.f32 %v2330_v13, %v784_v27  ;;  %v751_v40 = vadd.f32 %v750_v6, %v749_v25  ;;  %v1077_v59 = vrot.slane %v2330_v13, %v2158_v58  ;;  %v787_v27 = vld [vmem:[#allocation7 + $0x58] sm:$0xff] }
 0x4e9   :  { %v761_v22 = vsel %vm158_vm0, %v745_v12, 0.0  ;;  %v1094_v54 = vsel %vm350_vm2, %v1069_v14, %v1093_v29 }
 0x4ea   :  { %v757_v28 = vrot.slane %v756_v8, 2  ;;  %v762_v31 = vrot.slane %v761_v22, 4  ;;  %v1010_v32 = vsel %vm158_vm0, %v1006_v15, 0.0  ;;  %v741_v39 = vpop.permute.xlu1 %740  ;;  %v752_v9 = vrot.slane %v751_v40, 1 }
 0x4eb   :  { %v1011_v41 = vrot.slane %v1010_v32, 4  ;;  %v746_v51 = vmul.f32 %v741_v39, %v524_v18  ;;  %v1073_v52 = vrot.slane %v741_v39, %v2158_v58  ;;  %v999_v42 = vpop.permute.xlu0 %998 }
 0x4ec   :  { %v758_v53 = vadd.f32 %v757_v28, %v756_v8  ;;  %v763_v43 = vadd.f32 %v762_v31, %v761_v22  ;;  %v1008_v44 = vmul.f32 %v999_v42, %v786_v26  ;;  %v753_v4 = vadd.f32 %v752_v9, %v751_v40 }
 0x4ed   :  { %v1012_v47 = vadd.f32 %v1011_v41, %v1010_v32  ;;  %v768_v48 = vsel %vm158_vm0, %v746_v51, 0.0  ;;  %v1095_v49 = vsel %vm352_vm3, %v1073_v52, %v1094_v54  ;;  %v1085_v15 = vrot.slane %v999_v42, %v2158_v58 }
 0x4ee   :  { %v764_v50 = vrot.slane %v763_v43, 2  ;;  %v769_v30 = vrot.slane %v768_v48, 4  ;;  %1103 = vst.msk [vmem:[#allocation19 + $0x4] sm:$0xf] %vm355_vm4, %v1095_v49  ;;  %v994_v33 = vpop.permute.xlu1 %993  ;;  %v1024_v38 = vsel %vm158_vm0, %v1008_v44, 0.0  ;;  %v759_v10 = vrot.slane %v758_v53, 1 }
 0x4ef   :  { %v1013_v55 = vrot.slane %v1012_v47, 2  ;;  %v1007_v20 = vmul.f32 %v994_v33, %v785_v45  ;;  %v240_v16 = vpop.permute.xlu0 %239  ;;  %v1025_v60 = vrot.slane %v1024_v38, 4  ;;  %v1081_v61 = vrot.slane %v994_v33, %v2158_v58 }
 0x4f0   :  { %v765_v24 = vadd.f32 %v764_v50, %v763_v43  ;;  %v770_v57 = vadd.f32 %v769_v30, %v768_v48  ;;  %v242_v5 = vadd.f32 %v240_v16, %v2121_v34  ;;  %v243_v6 = vadd.f32 %v240_v16, %v2127_v37  ;;  %v1632_v30 = vld [vmem:[#allocation5] sm:$0xf] }
 0x4f1   :  { %v1017_v25 = vsel %vm158_vm0, %v1007_v20, 0.0  ;;  %v1014_v63 = vadd.f32 %v1013_v55, %v1012_v47  ;;  %v1026_v23 = vadd.f32 %v1025_v60, %v1024_v38  ;;  %v760_v12 = vadd.f32 %v759_v10, %v758_v53 }
 0x4f2   :  { %v766_v62 = vrot.slane %v765_v24, 1  ;;  %v771_v1 = vrot.slane %v770_v57, 2  ;;  %v1018_v2 = vrot.slane %v1017_v25, 4  ;;  %v1004_v3 = vpop.permute.xlu1 %1003  ;;  %v1096_v18 = vsel %vm348_vm1, %v1081_v61, %v1077_v59  ;;  %1277 = vrot.lane.b32.xlu1 %v242_v5, %s1902_s8  ;;  %1298 = vrot.lane.b32.xlu0 %v243_v6, %s1905_s30 }
 0x4f3   :  { %v1027_v14 = vrot.slane %v1026_v23, 2  ;;  %v1009_v19 = vmul.f32 %v1004_v3, %v787_v27  ;;  %v1015_v11 = vrot.slane %v1014_v63, 1  ;;  %v1089_v34 = vrot.slane %v1004_v3, %v2158_v58 }
 0x4f4   :  { %v767_v7 = vadd.f32 %v766_v62, %v765_v24  ;;  %v772_v13 = vadd.f32 %v771_v1, %v770_v57  ;;  %v1019_v8 = vadd.f32 %v1018_v2, %v1017_v25  ;;  %v775_v37 = vmul.f32 0.5, %v753_v4 }
 0x4f5   :  { %v1028_v29 = vadd.f32 %v1027_v14, %v1026_v23  ;;  %v1031_v31 = vsel %vm158_vm0, %v1009_v19, 0.0  ;;  %v776_v32 = vmul.f32 0.5, %v760_v12  ;;  %v1097_v40 = vsel %vm350_vm2, %v1085_v15, %v1096_v18  ;;  %v1326_v14 = vld [vmem:[#allocation14 + $0x8] sm:$0xff]  ;;  %v1327_v15 = vld [vmem:[#allocation14 + $0x10] sm:$0xff]  ;;  %v1328_v19 = vld [vmem:[#allocation14 + $0x18] sm:$0xff] }
 0x4f6   :  { %v773_v22 = vrot.slane %v772_v13, 1  ;;  %v1020_v26 = vrot.slane %v1019_v8, 2  ;;  %v777_v28 = vmul.f32 0.5, %v767_v7  ;;  %v1032_v41 = vrot.slane %v1031_v31, 4  ;;  %1288 = vrot.lane.b32.xlu0 %v243_v6, %s1902_s8 }
 0x4f7   :  { %v513_v51 = vmul.f32 0.5, %v497_v46  ;;  %v514_v52 = vmul.f32 0.5, %v504_v35  ;;  %v1029_v42 = vrot.slane %v1028_v29, 1  ;;  %v1098_v53 = vsel %vm352_vm3, %v1089_v34, %v1097_v40 }
 0x4f8   :  { %v1021_v39 = vadd.f32 %v1020_v26, %v1019_v8  ;;  %v1016_v43 = vadd.f32 %v1015_v11, %v1014_v63  ;;  %v774_v54 = vadd.f32 %v773_v22, %v772_v13  ;;  %v1033_v44 = vadd.f32 %v1032_v41, %v1031_v31  ;;  %1104 = vst.msk [vmem:[#allocation19 + $0x8] sm:$0xf] %vm355_vm4, %v1098_v53  ;;  %v1479_v63 = vld [vmem:[%s2432_s9] ss:$0 sm:$0xff]  ;;  %v1325_v8 = vld [vmem:[#allocation14] sm:$0xff] }
 0x4f9   :  { %v511_v45 = vadd.f32 %v510_v56, %v2335_v17  ;;  %v781_v47 = vadd.f32 %v777_v28, %v514_v52  ;;  %v1030_v48 = vadd.f32 %v1029_v42, %v1028_v29  ;;  %v779_v49 = vadd.f32 %v775_v37, %v2344_v36  ;;  %v1483_v53 = vld [vmem:[%s2433_s10] ss:$0 sm:$0xff] }
 0x4fa   :  { %v1022_v58 = vrot.slane %v1021_v39, 1  ;;  %v780_v50 = vadd.f32 %v776_v32, %v513_v51  ;;  %v1034_v35 = vrot.slane %v1033_v44, 2  ;;  %1314 = vrot.lane.b32.xlu0 %v1632_v30, %s1902_s8  ;;  %v778_v9 = vmul.f32 0.5, %v774_v54 }
 0x4fb   :  { %v1038_v33 = vadd.f32 %v1016_v43, %v779_v49  ;;  %v1040_v20 = vadd.f32 %v1030_v48, %v781_v47  ;;  %v515_v10 = vmul.f32 0.5, %v511_v45  ;;  %v1539_v18 = vpack.c.bf16 %v1326_v14, %v1325_v8 }
 0x4fc   :  { %v1023_v46 = vadd.f32 %v1022_v58, %v1021_v39  ;;  %v1035_v38 = vadd.f32 %v1034_v35, %v1033_v44  ;;  %v1542_v11 = vpack.c.bf16 %v1328_v19, %v1327_v15 }
 0x4fd   :  { %v782_v16 = vadd.f32 %v778_v9, %v515_v10 }
 0x4fe   :  { %v1039_v55 = vadd.f32 %v1023_v46, %v780_v50  ;;  %v1036_v24 = vrot.slane %v1035_v38, 1 }
 0x500   :  { %v1117_v57 = vsel %vm348_vm1, %v1039_v55, %v1038_v33  ;;  %v1037_v56 = vadd.f32 %v1036_v24, %v1035_v38 }
 0x501   :  { %v1118_v17 = vsel %vm350_vm2, %v1040_v20, %v1117_v57 }
 0x502   :  { %v1041_v36 = vadd.f32 %v1037_v56, %v782_v16 }
 0x504   :  { %v1119_v59 = vsel %vm352_vm3, %v1041_v36, %v1118_v17 }
 0x505   :  { %1477 = vmatmul.mubr.msk.f32.vlgmr.msra.gmra.mrb[0].mxu1 %vm158_vm0, %v1119_v59 }
 0x506   :  { %1513 = vmatprep.mubr.msk.f32.mxu1 %vm1908_vm5, %v1901_v0  ;;  %1540 = vmatpush3.bf16.msra.mxu1 %v1539_v18 }
 0x507   :  { %1541 = vmatprep.subr.bf16.mxu1 %v1907_v21 }
 0x50a   :  { %1543 = vmatpush3.bf16.msra.mxu1 %v1542_v11 }
 0x546   :  { %v1266_v60 = vpop.f32.mrb[2].mxu0 }
 0x547   :  { %v1504_v25 = vpop.f32.mrb[3].mxu0 }
 0x564   :  { %v1278_v27 = vpop.permute.xlu1 %1277  ;;  %v1299_v12 = vpop.permute.xlu0 %1298 }
 0x568   :  { %v1289_v26 = vpop.permute.xlu0 %1288 }
 0x56c   :  { %v1315_v32 = vpop.permute.xlu0 %1314 }
 0x5d8   :  { %v1188_v61 = vpop.f32.mrb[0].mxu1 }
 0x5d9   :  { %v1190_v62 = vpop.f32.mrb[1].mxu1 }
 0x5da   :  { %v1267_v1 = vadd.f32 %v1266_v60, %v1190_v62 }
 0x5dc   :  { %v1275_v2 = vadd.f32 %v1479_v63, %v1267_v1 }
 0x5de   :  { %v1280_v3 = vadd.f32 %v1278_v27, %v1275_v2  ;;  %v1291_v34 = vadd.f32 %v1289_v26, %v1275_v2 }
 0x5e0   :  { %v1480_v4 = vmul.f32 -1.442695, %v1280_v3  ;;  %v1481_v37 = vmul.f32 -1.442695, %v1291_v34 }
 0x5e2   :  { %1618 = vpow2.f32 %v1480_v4 }
 0x5ec   :  { %v1619_v23 = vpop.eup %1618 }
 0x5ed   :  { %v1284_v5 = vadd.f32 1.0, %v1619_v23 }
 0x5ef   :  { %1620 = vrcp.f32 %v1284_v5 }
 0x5f9   :  { %v1621_v6 = vpop.eup %1620 }
 0x5fa   :  { %v1301_v0 = vmul.f32 %v1621_v6, %v1299_v12 }
 0x5fc   :  { %1303 = vrot.lane.b32.xlu1 %v1301_v0, %s1903_s1 }
 0x66e   :  { %v1304_v7 = vpop.permute.xlu1 %1303 }
 0x66f   :  { %v1306_v13 = vadd.f32 %v1304_v7, %v1275_v2 }
 0x671   :  { %1622 = vtanh.f32 %v1306_v13 }
 0x672   :  { %1624 = vpow2.f32 %v1481_v37 }
 0x67b   :  { %v1623_v22 = vpop.eup %1622 }
 0x67c   :  { %1310 = vrot.lane.b32.xlu1 %v1623_v22, %s1905_s30  ;;  %v1625_v28 = vpop.eup %1624 }
 0x67d   :  { %v1295_v29 = vadd.f32 1.0, %v1625_v28 }
 0x67f   :  { %1626 = vrcp.f32 %v1295_v29 }
 0x689   :  { %v1627_v31 = vpop.eup %1626 }
 0x68a   :  { %v1308_v39 = vsub.f32 1.0, %v1627_v31  ;;  %v1317_v41 = vmul.f32 %v1627_v31, %v1315_v32 }
 0x6ee   :  { %v1311_v40 = vpop.permute.xlu1 %1310 }
 0x6ef   :  { %v1313_v51 = vmul.f32 %v1311_v40, %v1308_v39 }
 0x6f1   :  { %v1318_v52 = vadd.f32 %v1317_v41, %v1313_v51 }
 0x6f3   :  { %1320 = vrot.lane.b32.xlu1 %v1318_v52, %s1905_s30 }
 0x765   :  { %v1321_v21 = vpop.permute.xlu1 %1320 }
 0x766   :  { %1514 = vmatmul.mubr.msk.f32.vlgmr.msra.gmra.mrb[2].mxu1 %vm158_vm0, %v1321_v21  ;;  %1324 = vst.msk [vmem:[#allocation17] sm:$0xf] %vm1323_vm6, %v1321_v21 }
 0x839   :  { %v1397_v42 = vpop.f32.mrb[2].mxu1 }
 0x83a   :  { %v1398_v43 = vadd.f32 %v1397_v42, %v1188_v61  ;;  %v1515_v54 = vpop.f32.mrb[3].mxu1 }
 0x83c   :  { %v1408_v58 = vadd.f32 %v1483_v53, %v1398_v43 }
 0x83e   :  { %v1410_v44 = vsel %vm1409_vm7, %v1408_v58, -inf }
 0x83f   :  { %1411 = vmax.xlane.f32.xlu0 %v1410_v44 }
 0x8cc   :  { %v1412_v45 = vpop.xlane.xlu0 %1411 }
 0x8cd   :  { %v1413_v47 = vsub.f32 %v1408_v58, %v1412_v45 }
 0x8cf   :  { %v1414_v48 = vmul.f32 1.442695, %v1413_v47 }
 0x8d1   :  { %1628 = vpow2.f32 %v1414_v48 }
 0x8db   :  { %v1629_v49 = vpop.eup %1628 }
 0x8dc   :  { %v1416_v50 = vsel %vm1409_vm7, %v1629_v49, 0.0 }
 0x8dd   :  { %1417 = vadd.xlane.f32.xlu1 %v1416_v50 }
 0x8de   :  { %1820 = shalt.err (!%p1817_p12)
}
 0x8df   :  { %s1821_s28 = scalar_lea.hbm %s2435_s12, 64 }
 0x8e0   :  { %p1822_p13 = scmp.ne.s32.totalorder %s2435_s12, %s1821_s28  ;;  %p1825_p0 = scmp.lt.u32.totalorder %s1821_s28, %s2435_s12 }
 0x8e2   :  { %p1827_p1 = pnand %p1825_p0, %p1822_p13 }
 0x8e4   :  { %1830 = shalt.err (!%p1827_p1)
}
 0x8e5   :  { %1443 = dma.vmem_to_hbm [thread:$0]  %s1441_s23, 64, %s2435_s12, [#allocation18]  }
 0x8e6   :  { %s1910_s2 = smov [#allocation19]  }
 0x8e7   :  { %s1449_s8 = sshll.u32 %s1910_s2, 4  ;;  %s1450_s8 = int_to_ptr.vmem [resolvable:$true] %s1449_s8 }
 0x8e8   :  { %s1831_s26 = scalar_lea.vmem %s1450_s8, 192  ;;  %p1836_p3 = scmp.lt.s32.totalorder %s1450_s8, %s1450_s8 }
 0x8e9   :  { %p1832_p2 = scmp.ne.s32.totalorder %s1450_s8, %s1831_s26  ;;  %p1837_p4 = scmp.lt.s32.totalorder %s1831_s26, %s1831_s26 }
 0x8eb   :  { %p1838_p5 = por %p1837_p4, %p1836_p3 }
 0x8ed   :  { %p1839_p6 = pnand %p1838_p5, %p1832_p2 }
 0x8ef   :  { %1842 = shalt.err (!%p1839_p6)
}
 0x8f0   :  { %s1843_s17 = scalar_lea.hbm %s2436_s13, 192 }
 0x8f1   :  { %p1844_p7 = scmp.ne.s32.totalorder %s2436_s13, %s1843_s17  ;;  %p1847_p8 = scmp.lt.u32.totalorder %s1843_s17, %s2436_s13 }
 0x8f3   :  { %p1849_p9 = pnand %p1847_p8, %p1844_p7 }
 0x8f5   :  { %1852 = shalt.err (!%p1849_p9)
}
 0x8f6   :  { %s1911_s4 = smov 4   ;;  %s1912_s6 = smov [#allocation16]  }
 0x8f7   :  { %1455 = dma.vmem_to_hbm [thread:$0]  %s1450_s8, 192, %s2436_s13, [#allocation18], %s1903_s1, %s1903_s1, %s1911_s4  }
 0x8f8   :  { %s1430_s9 = sshll.u32 %s1912_s6, 4  ;;  %s1431_s9 = int_to_ptr.vmem [resolvable:$true] %s1430_s9 }
 0x8f9   :  { %s1853_s5 = scalar_lea.vmem %s1431_s9, 64  ;;  %p1858_p11 = scmp.lt.s32.totalorder %s1431_s9, %s1431_s9 }
 0x8fa   :  { %p1854_p10 = scmp.ne.s32.totalorder %s1431_s9, %s1853_s5  ;;  %p1859_p12 = scmp.lt.s32.totalorder %s1853_s5, %s1853_s5 }
 0x8fc   :  { %p1860_p13 = por %p1859_p12, %p1858_p11 }
 0x8fe   :  { %p1861_p0 = pnand %p1860_p13, %p1854_p10 }
 0x96a   :  { %v1418_v46 = vpop.xlane.xlu1 %1417 }
 0x96b   :  { %1630 = vlog2.f32 %v1418_v46 }
 0x975   :  { %v1631_v35 = vpop.eup %1630 }
 0x976   :  { %v1420_v30 = vmul.f32 0.6931472, %v1631_v35 }
 0x978   :  { %v1421_v33 = vadd.f32 %v1420_v30, %v1412_v45 }
 0x97a   :  { %v1422_v9 = vsub.f32 %v1408_v58, %v1421_v33 }
 0x97c   :  { %1423 = vst [vmem:[#allocation16] sm:$0xf] %v1422_v9 }
 0x97d   :  { %1864 = shalt.err (!%p1861_p0)
}
 0x97e   :  { %s1865_s13 = scalar_lea.hbm %s2434_s11, 64 }
 0x97f   :  { %p1866_p1 = scmp.ne.s32.totalorder %s2434_s11, %s1865_s13  ;;  %p1869_p2 = scmp.lt.u32.totalorder %s1865_s13, %s2434_s11 }
 0x981   :  { %p1871_p3 = pnand %p1869_p2, %p1866_p1 }
 0x983   :  { %1874 = shalt.err (!%p1871_p3)
}
 0x984   :  { %1433 = dma.vmem_to_hbm [thread:$0]  %s1431_s9, 64, %s2434_s11, [#allocation4]  }
 0x985   :  { %1885 = dma.done.wait [#allocation4], 64  }
 0x986   :  { %1886 = vsyncadd [#allocation4], 4294967232 }
 0x987   :  { %1887 = dma.done.wait [#allocation18], 256  }
 0x988   :  { %1888 = vsyncadd [#allocation18], 4294967040 }
 0x989   :  { %1465 = vsyncpa [#allocation3], 1 }
 0x98a   :  { %1466 = vsyncpa [#allocation6], 1 }
 0x98b   :  { %1467 = vsyncpa [#allocation9], 1 }
 0x98c   :  { %1468 = vsyncpa [#allocation12], 1 }
 0x98d   :  { %1469 = vsyncpa [#allocation15], 1 }
 0x98e   :  { %1470 = vsyncpa [#allocation4], 1 }
 0x98f   :  { %1471 = vsyncpa [#allocation18], 1 }

</bundles_post_ra>
